<compile_context>
chip_gen: v5e
topology: v5e:2x2
jax: 0.10.0
libtpu: 0.0.40
codegen_flags: <defaults>
</compile_context>

<pallas_src>
import jax
import jax.numpy as jnp
from jax.experimental import pallas as pl
from jax.experimental.pallas import tpu as pltpu

# Logical dims (PyTorch module) and lane-padded dims used by the kernel.
D_IN = 784
H1_LOGICAL, H2_LOGICAL, OUT_LOGICAL = 500, 100, 10
H1, H2, D_OUT = 512, 128, 128

MAX_TILE_N = 512  # fits comfortably in scoped VMEM on v5e/v6e/v7x with double buffering


def mlp_kernel(x_ref, w1_ref, b1_ref, w2_ref, b2_ref, w3_ref, b3_ref, o_ref):
    # Fused hot path: three bf16 MXU matmuls (f32 accumulate) + bias adds + two ReLUs,
    # all on the VMEM-resident weights and one streamed x tile.
    x = x_ref[...]  # (TILE_N, 784) bf16
    h1 = jnp.dot(x, w1_ref[...], preferred_element_type=jnp.float32) + b1_ref[...]
    h1 = jnp.maximum(h1, 0.0).astype(jnp.bfloat16)
    h2 = jnp.dot(h1, w2_ref[...], preferred_element_type=jnp.float32) + b2_ref[...]
    h2 = jnp.maximum(h2, 0.0).astype(jnp.bfloat16)
    o_ref[...] = jnp.dot(h2, w3_ref[...], preferred_element_type=jnp.float32) + b3_ref[...]


def init_params(key):
    """PyTorch-Linear-style init U(-1/sqrt(fan_in), 1/sqrt(fan_in)), stored as
    (in, out) so the kernel computes x @ W + b. Weights are zero-padded to the
    lane-aligned dims and cast to bf16; biases are padded and kept f32."""
    dims = [(D_IN, H1_LOGICAL), (H1_LOGICAL, H2_LOGICAL), (H2_LOGICAL, OUT_LOGICAL)]
    pads = [(D_IN, H1), (H1, H2), (H2, D_OUT)]
    keys = jax.random.split(key, 2 * len(dims))
    params = []
    for i, ((fan_in, fan_out), (pi, po)) in enumerate(zip(dims, pads)):
        bound = fan_in ** -0.5
        w = jax.random.uniform(keys[2 * i], (fan_in, fan_out),
                               minval=-bound, maxval=bound, dtype=jnp.float32)
        b = jax.random.uniform(keys[2 * i + 1], (1, fan_out),
                               minval=-bound, maxval=bound, dtype=jnp.float32)
        w_pad = jnp.zeros((pi, po), jnp.float32).at[:fan_in, :fan_out].set(w)
        b_pad = jnp.zeros((1, po), jnp.float32).at[:, :fan_out].set(b)
        params.extend([w_pad.astype(jnp.bfloat16), b_pad])
    return tuple(params)


def _round_up(a, m):
    return (a + m - 1) // m * m


def net_flatten_forward(x, params, tile_n=MAX_TILE_N):
    w1, b1, w2, b2, w3, b3 = params
    x2 = x.reshape(-1, D_IN)
    n = x2.shape[0]

    # Tile the batch; pad it to a multiple of the tile (multiple of 8 sublanes minimum).
    tn = min(tile_n, _round_up(n, 8))
    n_pad = _round_up(n, tn)
    if n_pad != n:
        x2 = jnp.pad(x2, ((0, n_pad - n), (0, 0)))
    x2 = x2.astype(jnp.bfloat16)

    def resident(shape):
        # Same block index every grid step -> Pallas keeps the buffer resident (no re-DMA).
        return pl.BlockSpec(shape, lambda i: (0, 0))

    out = pl.pallas_call(
        mlp_kernel,
        out_shape=jax.ShapeDtypeStruct((n_pad, D_OUT), jnp.float32),
        grid=(n_pad // tn,),
        in_specs=[
            pl.BlockSpec((tn, D_IN), lambda i: (i, 0)),   # streamed x tiles
            resident((D_IN, H1)), resident((1, H1)),      # resident weights / biases
            resident((H1, H2)), resident((1, H2)),
            resident((H2, D_OUT)), resident((1, D_OUT)),
        ],
        out_specs=pl.BlockSpec((tn, D_OUT), lambda i: (i, 0)),  # lane-dense (128-wide) store
        compiler_params=pltpu.CompilerParams(
            dimension_semantics=("parallel",)),           # shard batch across TCs on v7x
    )(x2, w1, b1, w2, b2, w3, b3)

    return out[:n, :OUT_LOGICAL]


def reference_forward(x, params):
    """Pure-JAX reference using the same bf16-quantized weights/activations, f32 math."""
    w1, b1, w2, b2, w3, b3 = params
    hp = jax.lax.Precision.HIGHEST
    x2 = x.reshape(-1, D_IN).astype(jnp.bfloat16).astype(jnp.float32)
    h1 = jnp.maximum(jnp.dot(x2, w1.astype(jnp.float32), precision=hp) + b1, 0.0)
    h1 = h1.astype(jnp.bfloat16).astype(jnp.float32)
    h2 = jnp.maximum(jnp.dot(h1, w2.astype(jnp.float32), precision=hp) + b2, 0.0)
    h2 = h2.astype(jnp.bfloat16).astype(jnp.float32)
    out = jnp.dot(h2, w3.astype(jnp.float32), precision=hp) + b3
    return out[:, :OUT_LOGICAL]


if __name__ == "__main__":
    key = jax.random.PRNGKey(0)
    k_x, k_p = jax.random.split(key)

    # MNIST-like NCHW input that flattens to (-1, 784)
    x = jax.random.normal(k_x, (8, 1, 28, 28), dtype=jnp.float32)
    params = init_params(k_p)

    out = jax.block_until_ready(net_flatten_forward(x, params))
    ref = reference_forward(x, params)

    assert out.shape == (8, 10), out.shape
    assert jnp.allclose(out, ref, atol=1e-2, rtol=1e-2), "mismatch vs pure-JAX reference"

    print("KERNEL_OK")
</pallas_src>

<mosaic_0001>
module attributes {stable_mosaic.version = 11 : i64} {
  func.func @mlp_kernel(%arg0: i32, %arg1: memref<8x784xbf16, #tpu.memory_space<vmem>>, %arg2: memref<784x512xbf16, #tpu.memory_space<vmem>>, %arg3: memref<1x512xf32, #tpu.memory_space<vmem>>, %arg4: memref<512x128xbf16, #tpu.memory_space<vmem>>, %arg5: memref<1x128xf32, #tpu.memory_space<vmem>>, %arg6: memref<128x128xbf16, #tpu.memory_space<vmem>>, %arg7: memref<1x128xf32, #tpu.memory_space<vmem>>, %arg8: memref<8x128xf32, #tpu.memory_space<vmem>>) attributes {dimension_semantics = [#tpu.dimension_semantics<parallel>], iteration_bounds = array<i64: 1>, scalar_prefetch = 0 : i64, scratch_operands = 0 : i64, tpu.core_type = #tpu.core_type<tc>, window_params = [{transform_indices = @transform_0, window_bounds = array<i64: 8, 784>}, {pipeline_mode = #tpu.pipeline_mode<synchronous>, transform_indices = @transform_1, window_bounds = array<i64: 784, 512>}, {pipeline_mode = #tpu.pipeline_mode<synchronous>, transform_indices = @transform_2, window_bounds = array<i64: 1, 512>}, {pipeline_mode = #tpu.pipeline_mode<synchronous>, transform_indices = @transform_3, window_bounds = array<i64: 512, 128>}, {pipeline_mode = #tpu.pipeline_mode<synchronous>, transform_indices = @transform_4, window_bounds = array<i64: 1, 128>}, {pipeline_mode = #tpu.pipeline_mode<synchronous>, transform_indices = @transform_5, window_bounds = array<i64: 128, 128>}, {pipeline_mode = #tpu.pipeline_mode<synchronous>, transform_indices = @transform_6, window_bounds = array<i64: 1, 128>}, {transform_indices = @transform_7, window_bounds = array<i64: 8, 128>}]} {
    %c0 = arith.constant 0 : index
    %c0_0 = arith.constant 0 : index
    %0 = vector.load %arg1[%c0, %c0_0] : memref<8x784xbf16, #tpu.memory_space<vmem>>, vector<8x784xbf16>
    %c0_1 = arith.constant 0 : index
    %c0_2 = arith.constant 0 : index
    %1 = vector.load %arg2[%c0_1, %c0_2] : memref<784x512xbf16, #tpu.memory_space<vmem>>, vector<784x512xbf16>
    %cst = arith.constant dense<0.000000e+00> : vector<8x512xf32>
    %2 = tpu.matmul %0, %1, %cst {dimension_numbers = #tpu.dot_dimension_numbers<[1], [0], [0], [1], [0, 0, 1, 1], [], []>} : vector<8x784xbf16>, vector<784x512xbf16>, vector<8x512xf32> -> vector<8x512xf32>
    %c0_3 = arith.constant 0 : index
    %c0_4 = arith.constant 0 : index
    %3 = vector.load %arg3[%c0_3, %c0_4] : memref<1x512xf32, #tpu.memory_space<vmem>>, vector<1x512xf32>
    %4 = vector.broadcast %3 : vector<1x512xf32> to vector<8x512xf32>
    %5 = arith.addf %2, %4 : vector<8x512xf32>
    %cst_5 = arith.constant 0.000000e+00 : f32
    %6 = vector.broadcast %cst_5 : f32 to vector<8x512xf32>
    %7 = arith.maximumf %5, %6 : vector<8x512xf32>
    %8 = arith.truncf %7 : vector<8x512xf32> to vector<8x512xbf16>
    %c0_6 = arith.constant 0 : index
    %c0_7 = arith.constant 0 : index
    %9 = vector.load %arg4[%c0_6, %c0_7] : memref<512x128xbf16, #tpu.memory_space<vmem>>, vector<512x128xbf16>
    %cst_8 = arith.constant dense<0.000000e+00> : vector<8x128xf32>
    %10 = tpu.matmul %8, %9, %cst_8 {dimension_numbers = #tpu.dot_dimension_numbers<[1], [0], [0], [1], [0, 0, 1, 1], [], []>} : vector<8x512xbf16>, vector<512x128xbf16>, vector<8x128xf32> -> vector<8x128xf32>
    %c0_9 = arith.constant 0 : index
    %c0_10 = arith.constant 0 : index
    %11 = vector.load %arg5[%c0_9, %c0_10] : memref<1x128xf32, #tpu.memory_space<vmem>>, vector<1x128xf32>
    %12 = vector.broadcast %11 : vector<1x128xf32> to vector<8x128xf32>
    %13 = arith.addf %10, %12 : vector<8x128xf32>
    %cst_11 = arith.constant 0.000000e+00 : f32
    %14 = vector.broadcast %cst_11 : f32 to vector<8x128xf32>
    %15 = arith.maximumf %13, %14 : vector<8x128xf32>
    %16 = arith.truncf %15 : vector<8x128xf32> to vector<8x128xbf16>
    %c0_12 = arith.constant 0 : index
    %c0_13 = arith.constant 0 : index
    %17 = vector.load %arg6[%c0_12, %c0_13] : memref<128x128xbf16, #tpu.memory_space<vmem>>, vector<128x128xbf16>
    %cst_14 = arith.constant dense<0.000000e+00> : vector<8x128xf32>
    %18 = tpu.matmul %16, %17, %cst_14 {dimension_numbers = #tpu.dot_dimension_numbers<[1], [0], [0], [1], [0, 0, 1, 1], [], []>} : vector<8x128xbf16>, vector<128x128xbf16>, vector<8x128xf32> -> vector<8x128xf32>
    %c0_15 = arith.constant 0 : index
    %c0_16 = arith.constant 0 : index
    %19 = vector.load %arg7[%c0_15, %c0_16] : memref<1x128xf32, #tpu.memory_space<vmem>>, vector<1x128xf32>
    %20 = vector.broadcast %19 : vector<1x128xf32> to vector<8x128xf32>
    %21 = arith.addf %18, %20 : vector<8x128xf32>
    %c0_17 = arith.constant 0 : index
    %c0_18 = arith.constant 0 : index
    %22 = vector.load %arg8[%c0_17, %c0_18] : memref<8x128xf32, #tpu.memory_space<vmem>>, vector<8x128xf32>
    tpu.vector_store %arg8[%c0_17, %c0_18], %21 {strides = array<i32>} : memref<8x128xf32, #tpu.memory_space<vmem>>, vector<8x128xf32>,
    return
  }
  func.func @transform_0(%arg0: i32) -> (i32, i32) {
    %c0_i32 = arith.constant 0 : i32
    %c0_i32_0 = arith.constant 0 : i32
    return %arg0, %c0_i32 : i32, i32
  }
  func.func @transform_1(%arg0: i32) -> (i32, i32) {
    %c0_i32 = arith.constant 0 : i32
    %c0_i32_0 = arith.constant 0 : i32
    %c0_i32_1 = arith.constant 0 : i32
    return %c0_i32, %c0_i32_0 : i32, i32
  }
  func.func @transform_2(%arg0: i32) -> (i32, i32) {
    %c0_i32 = arith.constant 0 : i32
    %c0_i32_0 = arith.constant 0 : i32
    %c0_i32_1 = arith.constant 0 : i32
    return %c0_i32, %c0_i32_0 : i32, i32
  }
  func.func @transform_3(%arg0: i32) -> (i32, i32) {
    %c0_i32 = arith.constant 0 : i32
    %c0_i32_0 = arith.constant 0 : i32
    %c0_i32_1 = arith.constant 0 : i32
    return %c0_i32, %c0_i32_0 : i32, i32
  }
  func.func @transform_4(%arg0: i32) -> (i32, i32) {
    %c0_i32 = arith.constant 0 : i32
    %c0_i32_0 = arith.constant 0 : i32
    %c0_i32_1 = arith.constant 0 : i32
    return %c0_i32, %c0_i32_0 : i32, i32
  }
  func.func @transform_5(%arg0: i32) -> (i32, i32) {
    %c0_i32 = arith.constant 0 : i32
    %c0_i32_0 = arith.constant 0 : i32
    %c0_i32_1 = arith.constant 0 : i32
    return %c0_i32, %c0_i32_0 : i32, i32
  }
  func.func @transform_6(%arg0: i32) -> (i32, i32) {
    %c0_i32 = arith.constant 0 : i32
    %c0_i32_0 = arith.constant 0 : i32
    %c0_i32_1 = arith.constant 0 : i32
    return %c0_i32, %c0_i32_0 : i32, i32
  }
  func.func @transform_7(%arg0: i32) -> (i32, i32) {
    %c0_i32 = arith.constant 0 : i32
    %c0_i32_0 = arith.constant 0 : i32
    return %arg0, %c0_i32 : i32, i32
  }
}

</mosaic_0001>

<bundles_post_ra>
// kernel: tpu_custom_call.1
= control target key start
LH: loop header
LB: loop body
LE: loop exit
PB: predicated region body
PF: predicated region fallthrough
CT: control target
= control target key end

     0   :  { %12 = vsyncpa [#allocation3], 0  ;;  %s3593_s0 = inlined_call_operand.hbm [shape: bf16[8,784], index: 0, kind: input, shape index: {}]   ;;  %s3594_s1 = inlined_call_operand.hbm [shape: bf16[784,512], index: 1, kind: input, shape index: {}]   ;;  %s3595_s2 = inlined_call_operand.hbm [shape: f32[1,512], index: 2, kind: input, shape index: {}]   ;;  %s3596_s3 = inlined_call_operand.hbm [shape: bf16[512,128], index: 3, kind: input, shape index: {}]   ;;  %s3597_s4 = inlined_call_operand.vmem [shape: f32[1,128], index: 4, kind: input, shape index: {}]   ;;  %s3598_s5 = inlined_call_operand.hbm [shape: bf16[128,128], index: 5, kind: input, shape index: {}]   ;;  %s3599_s6 = inlined_call_operand.vmem [shape: f32[1,128], index: 6, kind: input, shape index: {}]   ;;  %s3600_s7 = inlined_call_operand.hbm [shape: f32[8,128], index: 7, kind: output, shape index: {}]  }
   0x1   :  { %13 = vsyncpa [#allocation6], 0 }
   0x2   :  { %14 = vsyncpa [#allocation9], 0  ;;  %s31_s26 = sshll.u32 %s3594_s1, 4  ;;  %s32_s26 = int_to_ptr.hbm [resolvable:$true] %s31_s26 }
   0x3   :  { %15 = vsyncpa [#allocation4], 0  ;;  %s3455_s27 = smov [#allocation5]   ;;  %s55_s8 = sshll.u32 %s3596_s3, 4  ;;  %s56_s8 = int_to_ptr.hbm [resolvable:$true] %s55_s8 }
   0x4   :  { %s33_s28 = sshll.u32 %s3455_s27, 4  ;;  %s3456_s9 = smov 256   ;;  %s34_s28 = int_to_ptr.vmem [resolvable:$true] %s33_s28 }
   0x5   :  { %s3457_s10 = smov 16   ;;  %s3458_s11 = smov [#allocation8]  }
   0x6   :  { %39 = dma.hbm_to_vmem [thread:$0]  %s32_s26, 25088, %s34_s28, [#allocation6], %s3456_s9, %s3456_s9, %s3457_s10  }
   0x7   :  { %s57_s12 = sshll.u32 %s3458_s11, 4  ;;  %s3459_s13 = smov 64   ;;  %s58_s12 = int_to_ptr.vmem [resolvable:$true] %s57_s12 }
   0x8   :  { %s3460_s14 = smov 4   ;;  %s21_s16 = sshll.u32 %s3593_s0, 4  ;;  %s22_s16 = int_to_ptr.hbm [resolvable:$true] %s21_s16 }
   0x9   :  { %63 = dma.hbm_to_vmem [thread:$0]  %s56_s8, 4096, %s58_s12, [#allocation9], %s3459_s13, %s3459_s13, %s3460_s14  }
   0xa   :  { %s3461_s17 = smov [#allocation2]   ;;  %s45_s20 = sshll.u32 %s3595_s2, 4  ;;  %s46_s20 = int_to_ptr.hbm [resolvable:$true] %s45_s20 }
   0xb   :  { %s23_s18 = sshll.u32 %s3461_s17, 4  ;;  %s3462_s21 = smov [#allocation7]   ;;  %s24_s18 = int_to_ptr.vmem [resolvable:$true] %s23_s18 }
   0xc   :  { %26 = dma.hbm_to_vmem [thread:$0]  %s22_s16, 448, %s24_s18, [#allocation3]  }
   0xd   :  { %s47_s22 = sshll.u32 %s3462_s21, 4  ;;  %s70_s25 = sshll.u32 %s3598_s5, 4  ;;  %s48_s22 = int_to_ptr.vmem [resolvable:$true] %s47_s22  ;;  %s71_s25 = int_to_ptr.hbm [resolvable:$true] %s70_s25 }
   0xe   :  { %50 = dma.hbm_to_vmem [thread:$0]  %s46_s20, 64, %s48_s22, [#allocation6]  }
   0xf   :  { %s3463_s0 = smov [#allocation10]  }
  0x10   :  { %s72_s26 = sshll.u32 %s3463_s0, 4  ;;  %s73_s26 = int_to_ptr.vmem [resolvable:$true] %s72_s26 }
  0x11   :  { %78 = dma.hbm_to_vmem [thread:$0]  %s71_s25, 1024, %s73_s26, [#allocation9], %s3459_s13, %s3459_s13, %s3460_s14  }
  0x12   :  { %3447 = dma.done.wait [#allocation3], 448  }
  0x13   :  { %3448 = vsyncadd [#allocation3], 4294966848 }
  0x14   :  { %3449 = dma.done.wait [#allocation6], 25152  }
  0x15   :  { %3450 = vsyncadd [#allocation6], 4294942144 }
  0x16   :  { %3451 = dma.done.wait [#allocation9], 5120  }
  0x17   :  { %3452 = vsyncadd [#allocation9], 4294962176  ;;  %v2221_v0 = vld [vmem:[#allocation5 + $0xe0] sm:$0xf]  ;;  %v3085_v1 = vld [vmem:[#allocation5 + $0xec] sm:$0xf0] }
  0x18   :  { %v2349_v2 = vld [vmem:[#allocation5 + $0x1e0] sm:$0xf]  ;;  %v2222_v3 = vor.u32 %v3085_v1, %v2221_v0  ;;  %v3117_v4 = vld [vmem:[#allocation5 + $0x1ec] sm:$0xf0]  ;;  %vm1316_vm0 = vcmask 130048   ;;  %s3464_s28 = smov [#allocation11]  }
  0x19   :  { %v2477_v5 = vld [vmem:[#allocation5 + $0x2e0] sm:$0xf]  ;;  %v3149_v6 = vld [vmem:[#allocation5 + $0x2ec] sm:$0xf0]  ;;  %v2350_v7 = vor.u32 %v3117_v4, %v2349_v2  ;;  %s2093_s29 = sshll.u32 %s3464_s28, 4  ;;  %s2095_s9 = sshll.u32 %s3600_s7, 4  ;;  %s2094_s29 = int_to_ptr.vmem [resolvable:$true] %s2093_s29  ;;  %s2096_s9 = int_to_ptr.hbm [resolvable:$true] %s2095_s9 }
  0x1a   :  { %v2478_v8 = vor.u32 %v3149_v6, %v2477_v5  ;;  %v2605_v9 = vld [vmem:[#allocation5 + $0x3e0] sm:$0xf]  ;;  %v3181_v10 = vld [vmem:[#allocation5 + $0x3ec] sm:$0xf0]  ;;  %1320 = vmatpush.bf16.msra.mxu0 %v2222_v3 }
  0x1b   :  { %v2205_v11 = vld [vmem:[#allocation5 + $0xc0] sm:$0xf]  ;;  %v2606_v12 = vor.u32 %v3181_v10, %v2605_v9  ;;  %v3081_v13 = vld [vmem:[#allocation5 + $0xcc] sm:$0xf0]  ;;  %1333 = vmatpush.bf16.msra.mxu1 %v2350_v7 }
  0x1c   :  { %v2333_v14 = vld [vmem:[#allocation5 + $0x1c0] sm:$0xf]  ;;  %v3113_v15 = vld [vmem:[#allocation5 + $0x1cc] sm:$0xf0]  ;;  %1346 = vmatpush.bf16.msra.mxu2 %v2478_v8  ;;  %v2206_v16 = vor.u32 %v3081_v13, %v2205_v11 }
  0x1d   :  { %v2334_v17 = vor.u32 %v3113_v15, %v2333_v14  ;;  %v2461_v18 = vld [vmem:[#allocation5 + $0x2c0] sm:$0xf]  ;;  %v3145_v19 = vld [vmem:[#allocation5 + $0x2cc] sm:$0xf0]  ;;  %1359 = vmatpush.bf16.msra.mxu3 %v2606_v12 }
  0x1e   :  { %v2589_v20 = vld [vmem:[#allocation5 + $0x3c0] sm:$0xf]  ;;  %v2462_v21 = vor.u32 %v3145_v19, %v2461_v18  ;;  %v3177_v22 = vld [vmem:[#allocation5 + $0x3cc] sm:$0xf0]  ;;  %1321 = vmatpush.bf16.msra.mxu0 %v2206_v16 }
  0x1f   :  { %v2189_v23 = vld [vmem:[#allocation5 + $0xa0] sm:$0xf]  ;;  %v3077_v24 = vld [vmem:[#allocation5 + $0xac] sm:$0xf0]  ;;  %v2590_v25 = vor.u32 %v3177_v22, %v2589_v20  ;;  %1334 = vmatpush.bf16.msra.mxu1 %v2334_v17 }
  0x20   :  { %v2317_v26 = vld [vmem:[#allocation5 + $0x1a0] sm:$0xf]  ;;  %v3109_v27 = vld [vmem:[#allocation5 + $0x1ac] sm:$0xf0]  ;;  %v2190_v29 = vor.u32 %v3077_v24, %v2189_v23  ;;  %1347 = vmatpush.bf16.msra.mxu2 %v2462_v21 }
  0x21   :  { %v2445_v28 = vld [vmem:[#allocation5 + $0x2a0] sm:$0xf]  ;;  %v3141_v30 = vld [vmem:[#allocation5 + $0x2ac] sm:$0xf0]  ;;  %v2318_v33 = vor.u32 %v3109_v27, %v2317_v26  ;;  %1360 = vmatpush.bf16.msra.mxu3 %v2590_v25 }
  0x22   :  { %v2573_v31 = vld [vmem:[#allocation5 + $0x3a0] sm:$0xf]  ;;  %v3173_v32 = vld [vmem:[#allocation5 + $0x3ac] sm:$0xf0]  ;;  %v2446_v34 = vor.u32 %v3141_v30, %v2445_v28  ;;  %1322 = vmatpush.bf16.msra.mxu0 %v2190_v29 }
  0x23   :  { %v2173_v35 = vld [vmem:[#allocation5 + $0x80] sm:$0xf]  ;;  %v3073_v36 = vld [vmem:[#allocation5 + $0x8c] sm:$0xf0]  ;;  %v2574_v38 = vor.u32 %v3173_v32, %v2573_v31  ;;  %1335 = vmatpush.bf16.msra.mxu1 %v2318_v33 }
  0x24   :  { %v2301_v37 = vld [vmem:[#allocation5 + $0x180] sm:$0xf]  ;;  %v3105_v39 = vld [vmem:[#allocation5 + $0x18c] sm:$0xf0]  ;;  %v2174_v44 = vor.u32 %v3073_v36, %v2173_v35  ;;  %1348 = vmatpush.bf16.msra.mxu2 %v2446_v34  ;;  %v3083_v34 = vld [vmem:[#allocation5 + $0xe4] sm:$0xf] }
  0x25   :  { %v2429_v40 = vld [vmem:[#allocation5 + $0x280] sm:$0xf]  ;;  %v3137_v41 = vld [vmem:[#allocation5 + $0x28c] sm:$0xf0]  ;;  %v2302_v45 = vor.u32 %v3105_v39, %v2301_v37  ;;  %1361 = vmatpush.bf16.msra.mxu3 %v2574_v38  ;;  %v2223_v35 = vld [vmem:[#allocation5 + $0xf0] sm:$0xf0] }
  0x26   :  { %v2557_v42 = vld [vmem:[#allocation5 + $0x380] sm:$0xf]  ;;  %v3169_v43 = vld [vmem:[#allocation5 + $0x38c] sm:$0xf0]  ;;  %v2430_v46 = vor.u32 %v3137_v41, %v2429_v40  ;;  %1323 = vmatpush.bf16.msra.mxu0 %v2174_v44  ;;  %v102_v37 = vld [vmem:[#allocation2] sm:$0xff] }
  0x27   :  { %v2157_v47 = vld [vmem:[#allocation5 + $0x60] sm:$0xf]  ;;  %v3069_v48 = vld [vmem:[#allocation5 + $0x6c] sm:$0xf0]  ;;  %v2558_v50 = vor.u32 %v3169_v43, %v2557_v42  ;;  %1336 = vmatpush.bf16.msra.mxu1 %v2302_v45  ;;  %v316_v41 = vunpack.c.l.b16 %v102_v37 }
  0x28   :  { %v2285_v49 = vld [vmem:[#allocation5 + $0x160] sm:$0xf]  ;;  %v3101_v51 = vld [vmem:[#allocation5 + $0x16c] sm:$0xf0]  ;;  %v2158_v56 = vor.u32 %v3069_v48, %v2157_v47  ;;  %1349 = vmatpush.bf16.msra.mxu2 %v2430_v46  ;;  %v3115_v46 = vld [vmem:[#allocation5 + $0x1e4] sm:$0xf] }
  0x29   :  { %v2413_v52 = vld [vmem:[#allocation5 + $0x260] sm:$0xf]  ;;  %v3133_v53 = vld [vmem:[#allocation5 + $0x26c] sm:$0xf0]  ;;  %v2286_v57 = vor.u32 %v3101_v51, %v2285_v49  ;;  %1362 = vmatpush.bf16.msra.mxu3 %v2558_v50  ;;  %v2351_v47 = vld [vmem:[#allocation5 + $0x1f0] sm:$0xf0]  ;;  %v2226_v49 = vor.u32 %v3083_v34, %v2223_v35 }
  0x2a   :  { %v2541_v54 = vld [vmem:[#allocation5 + $0x360] sm:$0xf]  ;;  %v3165_v55 = vld [vmem:[#allocation5 + $0x36c] sm:$0xf0]  ;;  %v2414_v58 = vor.u32 %v3133_v53, %v2413_v52  ;;  %1324 = vmatpush.bf16.msra.mxu0 %v2158_v56  ;;  %v2207_v56 = vld [vmem:[#allocation5 + $0xd0] sm:$0xf0] }
  0x2b   :  { %v2141_v59 = vld [vmem:[#allocation5 + $0x40] sm:$0xf]  ;;  %v3065_v60 = vld [vmem:[#allocation5 + $0x4c] sm:$0xf0]  ;;  %v2542_v62 = vor.u32 %v3165_v55, %v2541_v54  ;;  %1337 = vmatpush.bf16.msra.mxu1 %v2286_v57  ;;  %v3079_v55 = vld [vmem:[#allocation5 + $0xc4] sm:$0xf]  ;;  %v3522_v57 = vpack.c.b16 %v316_v41, %v316_v41 }
  0x2c   :  { %v2269_v61 = vld [vmem:[#allocation5 + $0x140] sm:$0xf]  ;;  %v3097_v63 = vld [vmem:[#allocation5 + $0x14c] sm:$0xf0]  ;;  %v2142_v4 = vor.u32 %v3065_v60, %v2141_v59  ;;  %1350 = vmatpush.bf16.msra.mxu2 %v2414_v58  ;;  %v317_v58 = vunpack.c.h.b16 %v102_v37  ;;  %v2159_v34 = vld [vmem:[#allocation5 + $0x70] sm:$0xf0] }
  0x2d   :  { %v2397_v0 = vld [vmem:[#allocation5 + $0x240] sm:$0xf]  ;;  %v3129_v1 = vld [vmem:[#allocation5 + $0x24c] sm:$0xf0]  ;;  %v2270_v5 = vor.u32 %v3097_v63, %v2269_v61  ;;  %1363 = vmatpush.bf16.msra.mxu3 %v2542_v62  ;;  %v2354_v61 = vor.u32 %v3115_v46, %v2351_v47  ;;  %v3111_v63 = vld [vmem:[#allocation5 + $0x1c4] sm:$0xf] }
  0x2e   :  { %v2525_v2 = vld [vmem:[#allocation5 + $0x340] sm:$0xf]  ;;  %v3161_v3 = vld [vmem:[#allocation5 + $0x34c] sm:$0xf0]  ;;  %v2398_v6 = vor.u32 %v3129_v1, %v2397_v0  ;;  %1325 = vmatpush.bf16.msra.mxu0 %v2142_v4  ;;  %v2335_v0 = vld [vmem:[#allocation5 + $0x1d0] sm:$0xf0] }
  0x2f   :  { %v2125_v7 = vld [vmem:[#allocation5 + $0x20] sm:$0xf]  ;;  %v3061_v8 = vld [vmem:[#allocation5 + $0x2c] sm:$0xf0]  ;;  %v2526_v10 = vor.u32 %v3161_v3, %v2525_v2  ;;  %1338 = vmatpush.bf16.msra.mxu1 %v2270_v5  ;;  %v2210_v2 = vor.u32 %v3079_v55, %v2207_v56  ;;  %v3063_v46 = vld [vmem:[#allocation5 + $0x44] sm:$0xf] }
  0x30   :  { %v2253_v9 = vld [vmem:[#allocation5 + $0x120] sm:$0xf]  ;;  %v3093_v11 = vld [vmem:[#allocation5 + $0x12c] sm:$0xf0]  ;;  %v2126_v17 = vor.u32 %v3061_v8, %v2125_v7  ;;  %1351 = vmatpush.bf16.msra.mxu2 %v2398_v6  ;;  %v3075_v7 = vld [vmem:[#allocation5 + $0xa4] sm:$0xf] }
  0x31   :  { %v2381_v12 = vld [vmem:[#allocation5 + $0x220] sm:$0xf]  ;;  %v3125_v13 = vld [vmem:[#allocation5 + $0x22c] sm:$0xf0]  ;;  %v2254_v21 = vor.u32 %v3093_v11, %v2253_v9  ;;  %1364 = vmatpush.bf16.msra.mxu3 %v2526_v10  ;;  %v2191_v8 = vld [vmem:[#allocation5 + $0xb0] sm:$0xf0]  ;;  %v3528_v9 = vpack.c.b16 %v317_v58, %v317_v58  ;;  %v2338_v10 = vor.u32 %v3111_v63, %v2335_v0 }
  0x32   :  { %v2509_v14 = vld [vmem:[#allocation5 + $0x320] sm:$0xf]  ;;  %v3157_v15 = vld [vmem:[#allocation5 + $0x32c] sm:$0xf0]  ;;  %v2382_v22 = vor.u32 %v3125_v13, %v2381_v12  ;;  %1326 = vmatpush.bf16.msra.mxu0 %v2126_v17  ;;  %v3107_v12 = vld [vmem:[#allocation5 + $0x1a4] sm:$0xf] }
  0x33   :  { %v2109_v16 = vld [vmem:[#allocation5] sm:$0xf]  ;;  %v3057_v18 = vld [vmem:[#allocation5 + $0xc] sm:$0xf0]  ;;  %v2510_v26 = vor.u32 %v3157_v15, %v2509_v14  ;;  %1339 = vmatpush.bf16.msra.mxu1 %v2254_v21  ;;  %v2319_v13 = vld [vmem:[#allocation5 + $0x1b0] sm:$0xf0]  ;;  %v2194_v15 = vor.u32 %v3075_v7, %v2191_v8 }
  0x34   :  { %v2237_v19 = vld [vmem:[#allocation5 + $0x100] sm:$0xf]  ;;  %v3089_v20 = vld [vmem:[#allocation5 + $0x10c] sm:$0xf0]  ;;  %v2110_v33 = vor.u32 %v3057_v18, %v2109_v16  ;;  %1352 = vmatpush.bf16.msra.mxu2 %v2382_v22  ;;  %v2175_v21 = vld [vmem:[#allocation5 + $0x90] sm:$0xf0] }
  0x35   :  { %v2365_v23 = vld [vmem:[#allocation5 + $0x200] sm:$0xf]  ;;  %v3121_v24 = vld [vmem:[#allocation5 + $0x20c] sm:$0xf0]  ;;  %v2238_v38 = vor.u32 %v3089_v20, %v2237_v19  ;;  %1365 = vmatpush.bf16.msra.mxu3 %v2510_v26  ;;  %v3071_v20 = vld [vmem:[#allocation5 + $0x84] sm:$0xf] }
  0x36   :  { %v103_v25 = vld [vmem:[#allocation2 + $0x8] sm:$0xff]  ;;  %v2493_v27 = vld [vmem:[#allocation5 + $0x300] sm:$0xf]  ;;  %v2366_v39 = vor.u32 %v3121_v24, %v2365_v23  ;;  %1327 = vmatpush.bf16.msra.mxu0 %v2110_v33  ;;  %v105_v22 = vld [vmem:[#allocation2 + $0x18] sm:$0xf]  ;;  %v2322_v23 = vor.u32 %v3107_v12, %v2319_v13 }
  0x37   :  { %v3153_v28 = vld [vmem:[#allocation5 + $0x30c] sm:$0xf0]  ;;  %v2733_v29 = vld [vmem:[#allocation5 + $0x4e0] sm:$0xf]  ;;  %v318_v36 = vunpack.c.l.b16 %v103_v25  ;;  %v319_v42 = vunpack.c.h.b16 %v103_v25  ;;  %1340 = vmatpush.bf16.msra.mxu1 %v2238_v38  ;;  %v3103_v25 = vld [vmem:[#allocation5 + $0x184] sm:$0xf]  ;;  %v322_v35 = vunpack.c.l.b16 %v105_v22 }
  0x38   :  { %v3213_v30 = vld [vmem:[#allocation5 + $0x4ec] sm:$0xf0]  ;;  %v2861_v31 = vld [vmem:[#allocation5 + $0x5e0] sm:$0xf]  ;;  %v2494_v43 = vor.u32 %v3153_v28, %v2493_v27  ;;  %1353 = vmatpush.bf16.msra.mxu2 %v2366_v39  ;;  %v2303_v26 = vld [vmem:[#allocation5 + $0x190] sm:$0xf0]  ;;  %v2178_v28 = vor.u32 %v3071_v20, %v2175_v21 }
  0x39   :  { %v3245_v32 = vld [vmem:[#allocation5 + $0x5ec] sm:$0xf0]  ;;  %v2877_v40 = vld [vmem:[#allocation5 + $0x600] sm:$0xf]  ;;  %v2734_v44 = vor.u32 %v3213_v30, %v2733_v29  ;;  %v3520_v53 = vpack.c.b16 %v318_v36, %v318_v36  ;;  %v3524_v60 = vpack.c.b16 %v319_v42, %v319_v42  ;;  %1328 = vmatmul.bf16.vlgmr.msra.gmra.mxu0 %v3522_v57  ;;  %v3067_v33 = vld [vmem:[#allocation5 + $0x64] sm:$0xf]  ;;  %v2306_v36 = vor.u32 %v3103_v25, %v2303_v26 }
  0x3a   :  { %v3249_v45 = vld [vmem:[#allocation5 + $0x60c] sm:$0xf0]  ;;  %v2862_v48 = vor.u32 %v3245_v32, %v2861_v31  ;;  %v2717_v50 = vld [vmem:[#allocation5 + $0x4c0] sm:$0xf]  ;;  %1366 = vmatpush.bf16.msra.mxu3 %v2494_v43  ;;  %1341 = vmatmul.bf16.vlgmr.msra.gmra.mxu1 %v3528_v9  ;;  %v3099_v38 = vld [vmem:[#allocation5 + $0x164] sm:$0xf]  ;;  %v2162_v41 = vor.u32 %v3067_v33, %v2159_v34 }
  0x3b   :  { %v3209_v51 = vld [vmem:[#allocation5 + $0x4cc] sm:$0xf0]  ;;  %v2845_v52 = vld [vmem:[#allocation5 + $0x5c0] sm:$0xf]  ;;  %v2878_v59 = vor.u32 %v3249_v45, %v2877_v40  ;;  %1372 = vmatpush.bf16.msrb.mxu0 %v2734_v44  ;;  %1354 = vmatmul.bf16.vlgmr.msra.gmra.mxu2 %v3520_v53  ;;  %v2287_v39 = vld [vmem:[#allocation5 + $0x170] sm:$0xf0] }
  0x3c   :  { %v3241_v54 = vld [vmem:[#allocation5 + $0x5cc] sm:$0xf0]  ;;  %v2718_v62 = vor.u32 %v3209_v51, %v2717_v50  ;;  %1385 = vmatpush.bf16.msrb.mxu1 %v2862_v48  ;;  %v2701_v3 = vld [vmem:[#allocation5 + $0x4a0] sm:$0xf]  ;;  %v2143_v47 = vld [vmem:[#allocation5 + $0x50] sm:$0xf0]  ;;  %v3532_v48 = vpack.c.b16 %v322_v35, %v322_v35 }
  0x3d   :  { %v2846_v1 = vor.u32 %v3241_v54, %v2845_v52  ;;  %v3205_v4 = vld [vmem:[#allocation5 + $0x4ac] sm:$0xf0]  ;;  %v2829_v5 = vld [vmem:[#allocation5 + $0x5a0] sm:$0xf]  ;;  %1405 = vmatpush.bf16.msrb.mxu2 %v2878_v59  ;;  %1367 = vmatmul.bf16.vlgmr.msra.gmra.mxu3 %v3524_v60  ;;  %v3095_v51 = vld [vmem:[#allocation5 + $0x144] sm:$0xf]  ;;  %v2146_v55 = vor.u32 %v3063_v46, %v2143_v47 }
  0x3e   :  { %1411 = vmatpush.bf16.msrb.mxu3 %v2226_v49  ;;  %v3237_v6 = vld [vmem:[#allocation5 + $0x5ac] sm:$0xf0]  ;;  %v2702_v11 = vor.u32 %v3205_v4, %v2701_v3  ;;  %v2685_v16 = vld [vmem:[#allocation5 + $0x480] sm:$0xf]  ;;  %v2290_v49 = vor.u32 %v3099_v38, %v2287_v39  ;;  %v2271_v52 = vld [vmem:[#allocation5 + $0x150] sm:$0xf0] }
  0x3f   :  { %1373 = vmatpush.bf16.msrb.mxu0 %v2718_v62  ;;  %v2830_v14 = vor.u32 %v3237_v6, %v2829_v5  ;;  %v3201_v17 = vld [vmem:[#allocation5 + $0x48c] sm:$0xf0]  ;;  %v2813_v18 = vld [vmem:[#allocation5 + $0x580] sm:$0xf]  ;;  %v3059_v62 = vld [vmem:[#allocation5 + $0x24] sm:$0xf] }
  0x40   :  { %1386 = vmatpush.bf16.msrb.mxu1 %v2846_v1  ;;  %v3233_v19 = vld [vmem:[#allocation5 + $0x58c] sm:$0xf0]  ;;  %v2686_v24 = vor.u32 %v3201_v17, %v2685_v16  ;;  %v2669_v29 = vld [vmem:[#allocation5 + $0x460] sm:$0xf]  ;;  %v2127_v63 = vld [vmem:[#allocation5 + $0x30] sm:$0xf0]  ;;  %v2274_v1 = vor.u32 %v3095_v51, %v2271_v52 }
  0x41   :  { %1424 = vmatpush.bf16.msra.mxu2 %v2354_v61  ;;  %v2814_v27 = vor.u32 %v3233_v19, %v2813_v18  ;;  %v3197_v30 = vld [vmem:[#allocation5 + $0x46c] sm:$0xf0]  ;;  %v2797_v31 = vld [vmem:[#allocation5 + $0x560] sm:$0xf]  ;;  %v3091_v0 = vld [vmem:[#allocation5 + $0x124] sm:$0xf]  ;;  %v2130_v7 = vor.u32 %v3059_v62, %v2127_v63 }
  0x42   :  { %1412 = vmatpush.bf16.msrb.mxu3 %v2210_v2  ;;  %v3229_v32 = vld [vmem:[#allocation5 + $0x56c] sm:$0xf0]  ;;  %v2670_v37 = vor.u32 %v3197_v30, %v2669_v29  ;;  %v2653_v42 = vld [vmem:[#allocation5 + $0x440] sm:$0xf]  ;;  %v2255_v3 = vld [vmem:[#allocation5 + $0x130] sm:$0xf0] }
  0x43   :  { %1374 = vmatpush.bf16.msrb.mxu0 %v2702_v11  ;;  %v2798_v40 = vor.u32 %v3229_v32, %v2797_v31  ;;  %v3193_v43 = vld [vmem:[#allocation5 + $0x44c] sm:$0xf0]  ;;  %v2781_v44 = vld [vmem:[#allocation5 + $0x540] sm:$0xf]  ;;  %v104_v5 = vld [vmem:[#allocation2 + $0x10] sm:$0xff]  ;;  %v2258_v19 = vor.u32 %v3091_v0, %v2255_v3 }
  0x44   :  { %1387 = vmatpush.bf16.msrb.mxu1 %v2830_v14  ;;  %v3225_v45 = vld [vmem:[#allocation5 + $0x54c] sm:$0xf0]  ;;  %v2654_v50 = vor.u32 %v3193_v43, %v2653_v42  ;;  %v2637_v56 = vld [vmem:[#allocation5 + $0x420] sm:$0xf]  ;;  %v3055_v12 = vld [vmem:[#allocation5 + $0x4] sm:$0xf]  ;;  %v320_v18 = vunpack.c.l.b16 %v104_v5 }
  0x45   :  { %1425 = vmatpush.bf16.msra.mxu2 %v2338_v10  ;;  %v2782_v54 = vor.u32 %v3225_v45, %v2781_v44  ;;  %v3189_v58 = vld [vmem:[#allocation5 + $0x42c] sm:$0xf0]  ;;  %v2765_v59 = vld [vmem:[#allocation5 + $0x520] sm:$0xf]  ;;  %v2111_v13 = vld [vmem:[#allocation5 + $0x10] sm:$0xf0] }
  0x46   :  { %1413 = vmatpush.bf16.msrb.mxu3 %v2194_v15  ;;  %v3221_v61 = vld [vmem:[#allocation5 + $0x52c] sm:$0xf0]  ;;  %v2638_v2 = vor.u32 %v3189_v58, %v2637_v56  ;;  %v2621_v4 = vld [vmem:[#allocation5 + $0x400] sm:$0xf]  ;;  %v3147_v14 = vld [vmem:[#allocation5 + $0x2e4] sm:$0xf]  ;;  %v2114_v25 = vor.u32 %v3055_v12, %v2111_v13  ;;  %v3536_v34 = vpack.c.b16 %v320_v18, %v320_v18 }
  0x47   :  { %1375 = vmatpush.bf16.msrb.mxu0 %v2686_v24  ;;  %v2766_v6 = vor.u32 %v3221_v61, %v2765_v59  ;;  %v3185_v8 = vld [vmem:[#allocation5 + $0x40c] sm:$0xf0]  ;;  %v2749_v10 = vld [vmem:[#allocation5 + $0x500] sm:$0xf]  ;;  %v2479_v15 = vld [vmem:[#allocation5 + $0x2f0] sm:$0xf0] }
  0x48   :  { %1388 = vmatpush.bf16.msrb.mxu1 %v2814_v27  ;;  %v3217_v11 = vld [vmem:[#allocation5 + $0x50c] sm:$0xf0]  ;;  %v3179_v16 = vld [vmem:[#allocation5 + $0x3e4] sm:$0xf]  ;;  %v2607_v17 = vld [vmem:[#allocation5 + $0x3f0] sm:$0xf0]  ;;  %v2622_v20 = vor.u32 %v3185_v8, %v2621_v4 }
  0x49   :  { %1426 = vmatpush.bf16.msra.mxu2 %v2322_v23  ;;  %v3211_v21 = vld [vmem:[#allocation5 + $0x4e4] sm:$0xf]  ;;  %v2735_v22 = vld [vmem:[#allocation5 + $0x4f0] sm:$0xf0]  ;;  %v321_v23 = vunpack.c.h.b16 %v104_v5  ;;  %v2750_v24 = vor.u32 %v3217_v11, %v2749_v10  ;;  %v2610_v29 = vor.u32 %v3179_v16, %v2607_v17 }
  0x4a   :  { %1414 = vmatpush.bf16.msrb.mxu3 %v2178_v28  ;;  %v3087_v26 = vld [vmem:[#allocation5 + $0x104] sm:$0xf]  ;;  %v2239_v27 = vld [vmem:[#allocation5 + $0x110] sm:$0xf0]  ;;  %v2482_v28 = vor.u32 %v3147_v14, %v2479_v15  ;;  %v2738_v33 = vor.u32 %v3211_v21, %v2735_v22 }
  0x4b   :  { %1376 = vmatpush.bf16.msrb.mxu0 %v2670_v37  ;;  %2891 = vmatmul.msk.bf16.vlgmr.msrb.gmra.mxu2 %vm1316_vm0, %v3532_v48  ;;  %v3243_v30 = vld [vmem:[#allocation5 + $0x5e4] sm:$0xf]  ;;  %v2863_v31 = vld [vmem:[#allocation5 + $0x5f0] sm:$0xf0]  ;;  %v2242_v38 = vor.u32 %v3087_v26, %v2239_v27  ;;  %v3538_v39 = vpack.c.b16 %v321_v23, %v321_v23 }
  0x4c   :  { %1389 = vmatpush.bf16.msrb.mxu1 %v2798_v40  ;;  %v3143_v32 = vld [vmem:[#allocation5 + $0x2c4] sm:$0xf]  ;;  %v2463_v35 = vld [vmem:[#allocation5 + $0x2d0] sm:$0xf0]  ;;  %v2866_v42 = vor.u32 %v3243_v30, %v2863_v31 }
  0x4d   :  { %1427 = vmatpush.bf16.msra.mxu2 %v2306_v36  ;;  %v3175_v36 = vld [vmem:[#allocation5 + $0x3c4] sm:$0xf]  ;;  %v2591_v37 = vld [vmem:[#allocation5 + $0x3d0] sm:$0xf0]  ;;  %v2466_v43 = vor.u32 %v3143_v32, %v2463_v35 }
  0x4e   :  { %1415 = vmatpush.bf16.msrb.mxu3 %v2162_v41  ;;  %v3207_v40 = vld [vmem:[#allocation5 + $0x4c4] sm:$0xf]  ;;  %v2719_v41 = vld [vmem:[#allocation5 + $0x4d0] sm:$0xf0]  ;;  %v2594_v44 = vor.u32 %v3175_v36, %v2591_v37 }
  0x4f   :  { %1377 = vmatpush.bf16.msrb.mxu0 %v2654_v50  ;;  %v3239_v45 = vld [vmem:[#allocation5 + $0x5c4] sm:$0xf]  ;;  %v2847_v46 = vld [vmem:[#allocation5 + $0x5d0] sm:$0xf0] }
  0x50   :  { %1390 = vmatpush.bf16.msrb.mxu1 %v2782_v54  ;;  %v3139_v47 = vld [vmem:[#allocation5 + $0x2a4] sm:$0xf]  ;;  %v2447_v50 = vld [vmem:[#allocation5 + $0x2b0] sm:$0xf0]  ;;  %v2850_v56 = vor.u32 %v3239_v45, %v2847_v46 }
  0x51   :  { %1428 = vmatpush.bf16.msra.mxu2 %v2290_v49  ;;  %v2722_v49 = vor.u32 %v3207_v40, %v2719_v41  ;;  %v3171_v51 = vld [vmem:[#allocation5 + $0x3a4] sm:$0xf]  ;;  %v2575_v52 = vld [vmem:[#allocation5 + $0x3b0] sm:$0xf0]  ;;  %v2450_v58 = vor.u32 %v3139_v47, %v2447_v50 }
  0x52   :  { %1416 = vmatpush.bf16.msrb.mxu3 %v2146_v55  ;;  %v3203_v54 = vld [vmem:[#allocation5 + $0x4a4] sm:$0xf]  ;;  %v2703_v55 = vld [vmem:[#allocation5 + $0x4b0] sm:$0xf0]  ;;  %v2578_v59 = vor.u32 %v3171_v51, %v2575_v52 }
  0x53   :  { %1378 = vmatpush.bf16.msrb.mxu0 %v2638_v2  ;;  %v3235_v61 = vld [vmem:[#allocation5 + $0x5a4] sm:$0xf]  ;;  %v2831_v62 = vld [vmem:[#allocation5 + $0x5b0] sm:$0xf0]  ;;  %v2706_v0 = vor.u32 %v3203_v54, %v2703_v55 }
  0x54   :  { %1391 = vmatpush.bf16.msrb.mxu1 %v2766_v6  ;;  %v3135_v63 = vld [vmem:[#allocation5 + $0x284] sm:$0xf]  ;;  %v2559_v3 = vld [vmem:[#allocation5 + $0x390] sm:$0xf0]  ;;  %v2834_v6 = vor.u32 %v3235_v61, %v2831_v62  ;;  %v2229_v61 = vld [vmem:[#allocation5 + $0xe8] sm:$0xf] }
  0x55   :  { %1429 = vmatpush.bf16.msra.mxu2 %v2274_v1  ;;  %v2431_v1 = vld [vmem:[#allocation5 + $0x290] sm:$0xf0]  ;;  %v3167_v2 = vld [vmem:[#allocation5 + $0x384] sm:$0xf]  ;;  %v3086_v62 = vld [vmem:[#allocation5 + $0xf4] sm:$0xf0] }
  0x56   :  { %1417 = vmatpush.bf16.msrb.mxu3 %v2130_v7  ;;  %v3199_v4 = vld [vmem:[#allocation5 + $0x484] sm:$0xf]  ;;  %v2687_v5 = vld [vmem:[#allocation5 + $0x490] sm:$0xf0]  ;;  %v2434_v7 = vor.u32 %v3135_v63, %v2431_v1  ;;  %v2562_v8 = vor.u32 %v3167_v2, %v2559_v3  ;;  %v2357_v63 = vld [vmem:[#allocation5 + $0x1e8] sm:$0xf] }
  0x57   :  { %1379 = vmatpush.bf16.msrb.mxu0 %v2622_v20  ;;  %v3231_v10 = vld [vmem:[#allocation5 + $0x584] sm:$0xf]  ;;  %v2815_v11 = vld [vmem:[#allocation5 + $0x590] sm:$0xf0]  ;;  %v2690_v13 = vor.u32 %v3199_v4, %v2687_v5  ;;  %v3118_v1 = vld [vmem:[#allocation5 + $0x1f4] sm:$0xf0] }
  0x58   :  { %1392 = vmatpush.bf16.msrb.mxu1 %v2750_v24  ;;  %v3131_v12 = vld [vmem:[#allocation5 + $0x264] sm:$0xf]  ;;  %v2415_v14 = vld [vmem:[#allocation5 + $0x270] sm:$0xf0] }
  0x59   :  { %1430 = vmatpush.bf16.msra.mxu2 %v2258_v19  ;;  %v3163_v15 = vld [vmem:[#allocation5 + $0x364] sm:$0xf]  ;;  %v2543_v16 = vld [vmem:[#allocation5 + $0x370] sm:$0xf0]  ;;  %v2818_v19 = vor.u32 %v3231_v10, %v2815_v11  ;;  %v2418_v20 = vor.u32 %v3131_v12, %v2415_v14  ;;  %v2230_v11 = vor.u32 %v3086_v62, %v2229_v61  ;;  %v3150_v12 = vld [vmem:[#allocation5 + $0x2f4] sm:$0xf0] }
  0x5a   :  { %1418 = vmatpush.bf16.msrb.mxu3 %v2114_v25  ;;  %1380 = vmatmul.bf16.vlgmr.msrb.gmra.mxu0 %v3536_v34  ;;  %v3195_v17 = vld [vmem:[#allocation5 + $0x464] sm:$0xf]  ;;  %v2671_v18 = vld [vmem:[#allocation5 + $0x470] sm:$0xf0]  ;;  %v2546_v21 = vor.u32 %v3163_v15, %v2543_v16  ;;  %v3182_v14 = vld [vmem:[#allocation5 + $0x3f4] sm:$0xf0]  ;;  %v2358_v15 = vor.u32 %v3118_v1, %v2357_v63 }
  0x5b   :  { %1437 = vmatpush.bf16.msra.mxu0 %v2482_v28  ;;  %1393 = vmatmul.bf16.vlgmr.msrb.gmra.mxu1 %v3538_v39  ;;  %v3227_v22 = vld [vmem:[#allocation5 + $0x564] sm:$0xf]  ;;  %v2799_v23 = vld [vmem:[#allocation5 + $0x570] sm:$0xf0]  ;;  %v2674_v25 = vor.u32 %v3195_v17, %v2671_v18  ;;  %v2213_v17 = vld [vmem:[#allocation5 + $0xc8] sm:$0xf] }
  0x5c   :  { %1450 = vmatpush.bf16.msra.mxu1 %v2610_v29  ;;  %v3127_v24 = vld [vmem:[#allocation5 + $0x244] sm:$0xf]  ;;  %v2399_v26 = vld [vmem:[#allocation5 + $0x250] sm:$0xf0]  ;;  %v2802_v31 = vor.u32 %v3227_v22, %v2799_v23  ;;  %v3082_v18 = vld [vmem:[#allocation5 + $0xd4] sm:$0xf0] }
  0x5d   :  { %1431 = vmatpush.bf16.msra.mxu2 %v2242_v38  ;;  %1419 = vmatmul.bf16.vlgmr.msrb.gmra.mxu3 %v3522_v57  ;;  %v3159_v27 = vld [vmem:[#allocation5 + $0x344] sm:$0xf]  ;;  %v2527_v28 = vld [vmem:[#allocation5 + $0x350] sm:$0xf0]  ;;  %v2402_v32 = vor.u32 %v3127_v24, %v2399_v26  ;;  %v2469_v24 = vld [vmem:[#allocation5 + $0x2c8] sm:$0xf] }
  0x5e   :  { %1463 = vmatpush.bf16.msra.mxu3 %v2738_v33  ;;  %v3191_v29 = vld [vmem:[#allocation5 + $0x444] sm:$0xf]  ;;  %v2655_v30 = vld [vmem:[#allocation5 + $0x450] sm:$0xf0]  ;;  %v2530_v33 = vor.u32 %v3159_v27, %v2527_v28  ;;  %v3146_v26 = vld [vmem:[#allocation5 + $0x2d4] sm:$0xf0] }
  0x5f   :  { %1438 = vmatpush.bf16.msra.mxu0 %v2466_v43  ;;  %v3223_v35 = vld [vmem:[#allocation5 + $0x544] sm:$0xf]  ;;  %v2783_v36 = vld [vmem:[#allocation5 + $0x550] sm:$0xf0]  ;;  %v2658_v38 = vor.u32 %v3191_v29, %v2655_v30  ;;  %v2597_v27 = vld [vmem:[#allocation5 + $0x3c8] sm:$0xf] }
  0x60   :  { %1451 = vmatpush.bf16.msra.mxu1 %v2594_v44  ;;  %1432 = vmatmul.bf16.vlgmr.msra.gmra.mxu2 %v3528_v9  ;;  %v3123_v37 = vld [vmem:[#allocation5 + $0x224] sm:$0xf]  ;;  %v2383_v40 = vld [vmem:[#allocation5 + $0x230] sm:$0xf0]  ;;  %v2786_v46 = vor.u32 %v3223_v35, %v2783_v36  ;;  %v3178_v28 = vld [vmem:[#allocation5 + $0x3d4] sm:$0xf0]  ;;  %v2470_v35 = vor.u32 %v3146_v26, %v2469_v24 }
  0x61   :  { %1476 = vmatpush.bf16.msrb.mxu2 %v2866_v42  ;;  %v3155_v41 = vld [vmem:[#allocation5 + $0x324] sm:$0xf]  ;;  %v2511_v42 = vld [vmem:[#allocation5 + $0x330] sm:$0xf0]  ;;  %v2386_v51 = vor.u32 %v3123_v37, %v2383_v40  ;;  %v2197_v30 = vld [vmem:[#allocation5 + $0xa8] sm:$0xf]  ;;  %v2598_v36 = vor.u32 %v3178_v28, %v2597_v27 }
  0x62   :  { %1464 = vmatpush.bf16.msra.mxu3 %v2722_v49  ;;  %v3187_v43 = vld [vmem:[#allocation5 + $0x424] sm:$0xf]  ;;  %v2639_v44 = vld [vmem:[#allocation5 + $0x430] sm:$0xf0]  ;;  %v2514_v52 = vor.u32 %v3155_v41, %v2511_v42  ;;  %v2453_v37 = vld [vmem:[#allocation5 + $0x2a8] sm:$0xf] }
  0x63   :  { %1439 = vmatpush.bf16.msra.mxu0 %v2450_v58  ;;  %v3219_v45 = vld [vmem:[#allocation5 + $0x524] sm:$0xf]  ;;  %v2767_v47 = vld [vmem:[#allocation5 + $0x530] sm:$0xf0]  ;;  %v2642_v58 = vor.u32 %v3187_v43, %v2639_v44  ;;  %v3142_v40 = vld [vmem:[#allocation5 + $0x2b4] sm:$0xf0] }
  0x64   :  { %1452 = vmatpush.bf16.msra.mxu1 %v2578_v59  ;;  %v3119_v49 = vld [vmem:[#allocation5 + $0x204] sm:$0xf]  ;;  %v2367_v50 = vld [vmem:[#allocation5 + $0x210] sm:$0xf0]  ;;  %v2581_v41 = vld [vmem:[#allocation5 + $0x3a8] sm:$0xf] }
  0x65   :  { %1477 = vmatpush.bf16.msrb.mxu2 %v2850_v56  ;;  %v3151_v54 = vld [vmem:[#allocation5 + $0x304] sm:$0xf]  ;;  %v2495_v55 = vld [vmem:[#allocation5 + $0x310] sm:$0xf0]  ;;  %v2370_v4 = vor.u32 %v3119_v49, %v2367_v50  ;;  %v3174_v42 = vld [vmem:[#allocation5 + $0x3b4] sm:$0xf0]  ;;  %v2454_v49 = vor.u32 %v3142_v40, %v2453_v37 }
  0x66   :  { %1465 = vmatpush.bf16.msra.mxu3 %v2706_v0  ;;  %v3183_v56 = vld [vmem:[#allocation5 + $0x404] sm:$0xf]  ;;  %v2623_v59 = vld [vmem:[#allocation5 + $0x410] sm:$0xf0]  ;;  %v2770_v0 = vor.u32 %v3219_v45, %v2767_v47  ;;  %v2498_v5 = vor.u32 %v3151_v54, %v2495_v55  ;;  %v2181_v44 = vld [vmem:[#allocation5 + $0x88] sm:$0xf]  ;;  %v2582_v50 = vor.u32 %v3174_v42, %v2581_v41 }
  0x67   :  { %1440 = vmatpush.bf16.msra.mxu0 %v2434_v7  ;;  %v3247_v2 = vld [vmem:[#allocation5 + $0x604] sm:$0xf]  ;;  %v2879_v3 = vld [vmem:[#allocation5 + $0x610] sm:$0xf0]  ;;  %v2626_v10 = vor.u32 %v3183_v56, %v2623_v59  ;;  %v3074_v45 = vld [vmem:[#allocation5 + $0x94] sm:$0xf0] }
  0x68   :  { %1453 = vmatpush.bf16.msra.mxu1 %v2562_v8  ;;  %v2751_v7 = vld [vmem:[#allocation5 + $0x510] sm:$0xf0]  ;;  %v2485_v8 = vld [vmem:[#allocation5 + $0x2e8] sm:$0xf]  ;;  %v2882_v16 = vor.u32 %v3247_v2, %v2879_v3  ;;  %v3106_v47 = vld [vmem:[#allocation5 + $0x194] sm:$0xf0] }
  0x69   :  { %1478 = vmatpush.bf16.msrb.mxu2 %v2834_v6  ;;  %v3215_v6 = vld [vmem:[#allocation5 + $0x504] sm:$0xf]  ;;  %v2486_v22 = vor.u32 %v3150_v12, %v2485_v8  ;;  %v3138_v54 = vld [vmem:[#allocation5 + $0x294] sm:$0xf0]  ;;  %v2565_v55 = vld [vmem:[#allocation5 + $0x388] sm:$0xf] }
  0x6a   :  { %1466 = vmatpush.bf16.msra.mxu3 %v2690_v13  ;;  %v2613_v13 = vld [vmem:[#allocation5 + $0x3e8] sm:$0xf]  ;;  %v3170_v56 = vld [vmem:[#allocation5 + $0x394] sm:$0xf0] }
  0x6b   :  { %1441 = vmatpush.bf16.msra.mxu0 %v2418_v20  ;;  %v2341_v20 = vld [vmem:[#allocation5 + $0x1c8] sm:$0xf]  ;;  %v2614_v23 = vor.u32 %v3182_v14, %v2613_v13  ;;  %v3070_v61 = vld [vmem:[#allocation5 + $0x74] sm:$0xf0]  ;;  %v2566_v1 = vor.u32 %v3170_v56, %v2565_v55  ;;  %v2231_v55 = vld [vmem:[#allocation5 + $0xf8] sm:$0xf0] }
  0x6c   :  { %1454 = vmatpush.bf16.msra.mxu1 %v2546_v21  ;;  %v3114_v21 = vld [vmem:[#allocation5 + $0x1d4] sm:$0xf0]  ;;  %v2165_v59 = vld [vmem:[#allocation5 + $0x68] sm:$0xf] }
  0x6d   :  { %1479 = vmatpush.bf16.msrb.mxu2 %v2818_v19  ;;  %v2754_v19 = vor.u32 %v3215_v6, %v2751_v7  ;;  %v2342_v29 = vor.u32 %v3114_v21, %v2341_v20  ;;  %v2293_v62 = vld [vmem:[#allocation5 + $0x168] sm:$0xf]  ;;  %v3102_v63 = vld [vmem:[#allocation5 + $0x174] sm:$0xf0]  ;;  %v2166_v3 = vor.u32 %v3070_v61, %v2165_v59 }
  0x6e   :  { %1467 = vmatpush.bf16.msra.mxu3 %v2674_v25  ;;  %v2214_v25 = vor.u32 %v3082_v18, %v2213_v17  ;;  %v2421_v2 = vld [vmem:[#allocation5 + $0x268] sm:$0xf]  ;;  %v3166_v6 = vld [vmem:[#allocation5 + $0x374] sm:$0xf0]  ;;  %v2294_v7 = vor.u32 %v3102_v63, %v2293_v62 }
  0x6f   :  { %1442 = vmatpush.bf16.msra.mxu0 %v2402_v32  ;;  %v2325_v32 = vld [vmem:[#allocation5 + $0x1a8] sm:$0xf]  ;;  %v3098_v12 = vld [vmem:[#allocation5 + $0x154] sm:$0xf0] }
  0x70   :  { %1455 = vmatpush.bf16.msra.mxu1 %v2530_v33  ;;  %v3110_v33 = vld [vmem:[#allocation5 + $0x1b4] sm:$0xf0]  ;;  %v2149_v8 = vld [vmem:[#allocation5 + $0x48] sm:$0xf] }
  0x71   :  { %1480 = vmatpush.bf16.msrb.mxu2 %v2802_v31  ;;  %v3078_v31 = vld [vmem:[#allocation5 + $0xb4] sm:$0xf0]  ;;  %v2326_v43 = vor.u32 %v3110_v33, %v2325_v32  ;;  %v2533_v18 = vld [vmem:[#allocation5 + $0x348] sm:$0xf] }
  0x72   :  { %1468 = vmatpush.bf16.msra.mxu3 %v2658_v38  ;;  %v2198_v38 = vor.u32 %v3078_v31, %v2197_v30  ;;  %v3130_v17 = vld [vmem:[#allocation5 + $0x254] sm:$0xf0]  ;;  %v2133_v21 = vld [vmem:[#allocation5 + $0x28] sm:$0xf] }
  0x73   :  { %1443 = vmatpush.bf16.msra.mxu0 %v2386_v51  ;;  %v2437_v51 = vld [vmem:[#allocation5 + $0x288] sm:$0xf]  ;;  %v3094_v24 = vld [vmem:[#allocation5 + $0x134] sm:$0xf0] }
  0x74   :  { %1456 = vmatpush.bf16.msra.mxu1 %v2514_v52  ;;  %v2182_v52 = vor.u32 %v3074_v45, %v2181_v44  ;;  %v2389_v27 = vld [vmem:[#allocation5 + $0x228] sm:$0xf]  ;;  %v3126_v28 = vld [vmem:[#allocation5 + $0x234] sm:$0xf0] }
  0x75   :  { %1481 = vmatpush.bf16.msrb.mxu2 %v2786_v46  ;;  %v2309_v46 = vld [vmem:[#allocation5 + $0x188] sm:$0xf]  ;;  %v3158_v31 = vld [vmem:[#allocation5 + $0x334] sm:$0xf0]  ;;  %v2390_v42 = vor.u32 %v3126_v28, %v2389_v27 }
  0x76   :  { %1469 = vmatpush.bf16.msra.mxu3 %v2642_v58  ;;  %v2310_v58 = vor.u32 %v3106_v47, %v2309_v46  ;;  %v2517_v30 = vld [vmem:[#allocation5 + $0x328] sm:$0xf]  ;;  %v3090_v37 = vld [vmem:[#allocation5 + $0x114] sm:$0xf0] }
  0x77   :  { %1444 = vmatpush.bf16.msra.mxu0 %v2370_v4  ;;  %v3134_v4 = vld [vmem:[#allocation5 + $0x274] sm:$0xf0]  ;;  %v2117_v32 = vld [vmem:[#allocation5 + $0x8] sm:$0xf] }
  0x78   :  { %1457 = vmatpush.bf16.msra.mxu1 %v2498_v5  ;;  %v2549_v5 = vld [vmem:[#allocation5 + $0x368] sm:$0xf]  ;;  %v2422_v13 = vor.u32 %v3134_v4, %v2421_v2  ;;  %v3214_v40 = vld [vmem:[#allocation5 + $0x4f4] sm:$0xf0] }
  0x79   :  { %1482 = vmatpush.bf16.msrb.mxu2 %v2770_v0  ;;  %v2438_v0 = vor.u32 %v3138_v54, %v2437_v51  ;;  %v2550_v14 = vor.u32 %v3166_v6, %v2549_v5  ;;  %v2869_v41 = vld [vmem:[#allocation5 + $0x5e8] sm:$0xf]  ;;  %v3246_v44 = vld [vmem:[#allocation5 + $0x5f4] sm:$0xf0]  ;;  %v3084_v51 = vld [vmem:[#allocation5 + $0xec] sm:$0xf] }
  0x7a   :  { %1470 = vmatpush.bf16.msra.mxu3 %v2626_v10  ;;  %1445 = vmatmul.bf16.vlgmr.msra.gmra.mxu0 %v3520_v53  ;;  %v3066_v10 = vld [vmem:[#allocation5 + $0x54] sm:$0xf0]  ;;  %v2373_v45 = vld [vmem:[#allocation5 + $0x208] sm:$0xf]  ;;  %v2870_v59 = vor.u32 %v3246_v44, %v2869_v41  ;;  %v3116_v5 = vld [vmem:[#allocation5 + $0x1ec] sm:$0xf] }
  0x7b   :  { %1496 = vmatpush.bf16.msrb.mxu0 %v2882_v16  ;;  %1458 = vmatmul.bf16.vlgmr.msra.gmra.mxu1 %v3524_v60  ;;  %v2150_v16 = vor.u32 %v3066_v10, %v2149_v8  ;;  %v3122_v46 = vld [vmem:[#allocation5 + $0x214] sm:$0xf0]  ;;  %v2885_v56 = vld [vmem:[#allocation5 + $0x608] sm:$0xf]  ;;  %v2359_v6 = vld [vmem:[#allocation5 + $0x1f8] sm:$0xf0] }
  0x7c   :  { %1502 = vmatpush.bf16.msrb.mxu1 %v2230_v11  ;;  %v2277_v11 = vld [vmem:[#allocation5 + $0x148] sm:$0xf]  ;;  %v3210_v62 = vld [vmem:[#allocation5 + $0x4d4] sm:$0xf0]  ;;  %v2374_v63 = vor.u32 %v3122_v46, %v2373_v45  ;;  %v3080_v8 = vld [vmem:[#allocation5 + $0xcc] sm:$0xf] }
  0x7d   :  { %1483 = vmatpush.bf16.msrb.mxu2 %v2754_v19  ;;  %1471 = vmatmul.bf16.vlgmr.msra.gmra.mxu3 %v3536_v34  ;;  %v3162_v19 = vld [vmem:[#allocation5 + $0x354] sm:$0xf0]  ;;  %v2278_v20 = vor.u32 %v3098_v12, %v2277_v11  ;;  %v2725_v61 = vld [vmem:[#allocation5 + $0x4c8] sm:$0xf]  ;;  %v2215_v10 = vld [vmem:[#allocation5 + $0xd8] sm:$0xf0] }
  0x7e   :  { %1515 = vmatpush.bf16.msrb.mxu3 %v2358_v15  ;;  %v2405_v15 = vld [vmem:[#allocation5 + $0x248] sm:$0xf]  ;;  %v2534_v26 = vor.u32 %v3162_v19, %v2533_v18  ;;  %v3242_v2 = vld [vmem:[#allocation5 + $0x5d4] sm:$0xf0]  ;;  %v3112_v18 = vld [vmem:[#allocation5 + $0x1cc] sm:$0xf] }
  0x7f   :  { %1528 = vmatpush.bf16.msra.mxu0 %v2486_v22  ;;  %v3062_v22 = vld [vmem:[#allocation5 + $0x34] sm:$0xf0]  ;;  %v2709_v12 = vld [vmem:[#allocation5 + $0x4a8] sm:$0xf]  ;;  %v2343_v19 = vld [vmem:[#allocation5 + $0x1d8] sm:$0xf0] }
  0x80   :  { %1503 = vmatpush.bf16.msrb.mxu1 %v2214_v25  ;;  %1484 = vmatmul.bf16.vlgmr.msrb.gmra.mxu2 %v3538_v39  ;;  %v2406_v25 = vor.u32 %v3130_v17, %v2405_v15  ;;  %v2837_v15 = vld [vmem:[#allocation5 + $0x5a8] sm:$0xf]  ;;  %v2218_v17 = vor.u32 %v3080_v8, %v2215_v10  ;;  %v3234_v28 = vld [vmem:[#allocation5 + $0x594] sm:$0xf0]  ;;  %v3104_v44 = vld [vmem:[#allocation5 + $0x18c] sm:$0xf] }
  0x81   :  { %1541 = vmatpush.bf16.msra.mxu2 %v2614_v23  ;;  %v2261_v23 = vld [vmem:[#allocation5 + $0x128] sm:$0xf]  ;;  %v2311_v45 = vld [vmem:[#allocation5 + $0x198] sm:$0xf0]  ;;  %v3096_v8 = vld [vmem:[#allocation5 + $0x14c] sm:$0xf] }
  0x82   :  { %1516 = vmatpush.bf16.msrb.mxu3 %v2342_v29  ;;  %v2134_v29 = vor.u32 %v3062_v22, %v2133_v21  ;;  %v2262_v33 = vor.u32 %v3094_v24, %v2261_v23  ;;  %v3076_v21 = vld [vmem:[#allocation5 + $0xac] sm:$0xf]  ;;  %v2199_v22 = vld [vmem:[#allocation5 + $0xb8] sm:$0xf0]  ;;  %v2693_v24 = vld [vmem:[#allocation5 + $0x488] sm:$0xf] }
  0x83   :  { %1529 = vmatpush.bf16.msra.mxu0 %v2470_v35  ;;  %v3058_v35 = vld [vmem:[#allocation5 + $0x14] sm:$0xf0]  ;;  %v2821_v27 = vld [vmem:[#allocation5 + $0x588] sm:$0xf]  ;;  %v2279_v10 = vld [vmem:[#allocation5 + $0x158] sm:$0xf0] }
  0x84   :  { %1504 = vmatpush.bf16.msrb.mxu1 %v2198_v38  ;;  %v2741_v38 = vld [vmem:[#allocation5 + $0x4e8] sm:$0xf]  ;;  %v2118_v47 = vor.u32 %v3058_v35, %v2117_v32  ;;  %v2183_v35 = vld [vmem:[#allocation5 + $0x98] sm:$0xf0] }
  0x85   :  { %1542 = vmatpush.bf16.msra.mxu2 %v2598_v36  ;;  %v2245_v36 = vld [vmem:[#allocation5 + $0x108] sm:$0xf]  ;;  %v2742_v54 = vor.u32 %v3214_v40, %v2741_v38  ;;  %v3198_v38 = vld [vmem:[#allocation5 + $0x474] sm:$0xf0] }
  0x86   :  { %1517 = vmatpush.bf16.msrb.mxu3 %v2326_v43  ;;  %v2518_v43 = vor.u32 %v3158_v31, %v2517_v30  ;;  %v3108_v30 = vld [vmem:[#allocation5 + $0x1ac] sm:$0xf]  ;;  %v2327_v31 = vld [vmem:[#allocation5 + $0x1b8] sm:$0xf0]  ;;  %v2805_v41 = vld [vmem:[#allocation5 + $0x568] sm:$0xf] }
  0x87   :  { %1530 = vmatpush.bf16.msra.mxu0 %v2454_v49  ;;  %v2501_v49 = vld [vmem:[#allocation5 + $0x308] sm:$0xf]  ;;  %v2330_v40 = vor.u32 %v3108_v30, %v2327_v31 }
  0x88   :  { %1505 = vmatpush.bf16.msrb.mxu1 %v2182_v52  ;;  %v2246_v52 = vor.u32 %v3090_v37, %v2245_v36  ;;  %v2822_v36 = vor.u32 %v3234_v28, %v2821_v27  ;;  %v2677_v37 = vld [vmem:[#allocation5 + $0x468] sm:$0xf]  ;;  %v3056_v28 = vld [vmem:[#allocation5 + $0xc] sm:$0xf] }
  0x89   :  { %1543 = vmatpush.bf16.msra.mxu2 %v2582_v50  ;;  %v3154_v50 = vld [vmem:[#allocation5 + $0x314] sm:$0xf0]  ;;  %v2678_v46 = vor.u32 %v3198_v38, %v2677_v37  ;;  %v3144_v37 = vld [vmem:[#allocation5 + $0x2cc] sm:$0xf]  ;;  %v2471_v38 = vld [vmem:[#allocation5 + $0x2d8] sm:$0xf0] }
  0x8a   :  { %1518 = vmatpush.bf16.msrb.mxu3 %v2310_v58  ;;  %2892 = vmatmul.msk.bf16.vlgmr.msrb.gmra.mxu0 %vm1316_vm0, %v3532_v48  ;;  %v3250_v58 = vld [vmem:[#allocation5 + $0x614] sm:$0xf0] }
  0x8b   :  { %1531 = vmatpush.bf16.msra.mxu0 %v2438_v0  ;;  %v2502_v0 = vor.u32 %v3154_v50, %v2501_v49  ;;  %v2886_v4 = vor.u32 %v3250_v58, %v2885_v56  ;;  %v2167_v49 = vld [vmem:[#allocation5 + $0x78] sm:$0xf0]  ;;  %v3226_v56 = vld [vmem:[#allocation5 + $0x554] sm:$0xf0] }
  0x8c   :  { %1506 = vmatpush.bf16.msrb.mxu1 %v2166_v3  ;;  %v2234_v3 = vor.u32 %v3084_v51, %v2231_v55  ;;  %v2661_v51 = vld [vmem:[#allocation5 + $0x448] sm:$0xf] }
  0x8d   :  { %1544 = vmatpush.bf16.msra.mxu2 %v2566_v1  ;;  %v2853_v1 = vld [vmem:[#allocation5 + $0x5c8] sm:$0xf] }
  0x8e   :  { %1519 = vmatpush.bf16.msrb.mxu3 %v2294_v7  ;;  %v2726_v7 = vor.u32 %v3210_v62, %v2725_v61  ;;  %v2854_v11 = vor.u32 %v3242_v2, %v2853_v1  ;;  %v2789_v55 = vld [vmem:[#allocation5 + $0x548] sm:$0xf]  ;;  %v2295_v61 = vld [vmem:[#allocation5 + $0x178] sm:$0xf0] }
  0x8f   :  { %1532 = vmatpush.bf16.msra.mxu0 %v2422_v13  ;;  %v3206_v13 = vld [vmem:[#allocation5 + $0x4b4] sm:$0xf0]  ;;  %v2790_v1 = vor.u32 %v3226_v56, %v2789_v55  ;;  %v2645_v2 = vld [vmem:[#allocation5 + $0x428] sm:$0xf]  ;;  %v3140_v55 = vld [vmem:[#allocation5 + $0x2ac] sm:$0xf] }
  0x90   :  { %1507 = vmatpush.bf16.msrb.mxu1 %v2150_v16  ;;  %v3238_v16 = vld [vmem:[#allocation5 + $0x5b4] sm:$0xf0]  ;;  %v2455_v56 = vld [vmem:[#allocation5 + $0x2b8] sm:$0xf0] }
  0x91   :  { %1545 = vmatpush.bf16.msra.mxu2 %v2550_v14  ;;  %v2362_v14 = vor.u32 %v3116_v5, %v2359_v6  ;;  %v2838_v23 = vor.u32 %v3238_v16, %v2837_v15  ;;  %v2773_v5 = vld [vmem:[#allocation5 + $0x528] sm:$0xf]  ;;  %v3222_v6 = vld [vmem:[#allocation5 + $0x534] sm:$0xf0] }
  0x92   :  { %1520 = vmatpush.bf16.msrb.mxu3 %v2278_v20  ;;  %v2710_v20 = vor.u32 %v3206_v13, %v2709_v12  ;;  %v3060_v12 = vld [vmem:[#allocation5 + $0x2c] sm:$0xf]  ;;  %v2135_v13 = vld [vmem:[#allocation5 + $0x38] sm:$0xf0]  ;;  %v2774_v15 = vor.u32 %v3222_v6, %v2773_v5  ;;  %v3186_v16 = vld [vmem:[#allocation5 + $0x414] sm:$0xf0] }
  0x93   :  { %1533 = vmatpush.bf16.msra.mxu0 %v2406_v25  ;;  %v3202_v25 = vld [vmem:[#allocation5 + $0x494] sm:$0xf0]  ;;  %v3136_v5 = vld [vmem:[#allocation5 + $0x28c] sm:$0xf]  ;;  %v2439_v6 = vld [vmem:[#allocation5 + $0x298] sm:$0xf0] }
  0x94   :  { %1508 = vmatpush.bf16.msrb.mxu1 %v2134_v29  ;;  %v2202_v29 = vor.u32 %v3076_v21, %v2199_v22  ;;  %v2694_v32 = vor.u32 %v3202_v25, %v2693_v24  ;;  %v2487_v21 = vld [vmem:[#allocation5 + $0x2f8] sm:$0xf0]  ;;  %v3180_v22 = vld [vmem:[#allocation5 + $0x3ec] sm:$0xf] }
  0x95   :  { %1546 = vmatpush.bf16.msra.mxu2 %v2534_v26  ;;  %v2346_v26 = vor.u32 %v3112_v18, %v2343_v19  ;;  %v3218_v18 = vld [vmem:[#allocation5 + $0x514] sm:$0xf0]  ;;  %v2282_v19 = vor.u32 %v3096_v8, %v2279_v10  ;;  %v2615_v24 = vld [vmem:[#allocation5 + $0x3f8] sm:$0xf0]  ;;  %v3092_v25 = vld [vmem:[#allocation5 + $0x12c] sm:$0xf] }
  0x96   :  { %1521 = vmatpush.bf16.msrb.mxu3 %v2262_v33  ;;  %v3072_v33 = vld [vmem:[#allocation5 + $0x8c] sm:$0xf]  ;;  %v2567_v10 = vld [vmem:[#allocation5 + $0x398] sm:$0xf0] }
  0x97   :  { %1534 = vmatpush.bf16.msra.mxu0 %v2390_v42  ;;  %v3230_v42 = vld [vmem:[#allocation5 + $0x574] sm:$0xf0]  ;;  %v3168_v8 = vld [vmem:[#allocation5 + $0x38c] sm:$0xf] }
  0x98   :  { %1509 = vmatpush.bf16.msrb.mxu1 %v2118_v47  ;;  %v3068_v47 = vld [vmem:[#allocation5 + $0x6c] sm:$0xf]  ;;  %v2806_v50 = vor.u32 %v3230_v42, %v2805_v41  ;;  %v2599_v42 = vld [vmem:[#allocation5 + $0x3d8] sm:$0xf0] }
  0x99   :  { %1547 = vmatpush.bf16.msra.mxu2 %v2518_v43  ;;  %v2186_v43 = vor.u32 %v3072_v33, %v2183_v35  ;;  %v2170_v58 = vor.u32 %v3068_v47, %v2167_v49  ;;  %v2743_v33 = vld [vmem:[#allocation5 + $0x4f8] sm:$0xf0]  ;;  %v2618_v35 = vor.u32 %v3180_v22, %v2615_v24  ;;  %v2474_v49 = vor.u32 %v3144_v37, %v2471_v38  ;;  %v3232_v24 = vld [vmem:[#allocation5 + $0x58c] sm:$0xf] }
  0x9a   :  { %1522 = vmatpush.bf16.msrb.mxu3 %v2246_v52  ;;  %v3194_v52 = vld [vmem:[#allocation5 + $0x454] sm:$0xf0]  ;;  %v2871_v47 = vld [vmem:[#allocation5 + $0x5f8] sm:$0xf0]  ;;  %v3228_v37 = vld [vmem:[#allocation5 + $0x56c] sm:$0xf] }
  0x9b   :  { %1535 = vmatpush.bf16.msra.mxu0 %v2374_v63  ;;  %1510 = vmatmul.bf16.vlgmr.msrb.gmra.mxu1 %v3522_v57  ;;  %v2662_v62 = vor.u32 %v3194_v52, %v2661_v51  ;;  %v3064_v63 = vld [vmem:[#allocation5 + $0x4c] sm:$0xf]  ;;  %v2727_v51 = vld [vmem:[#allocation5 + $0x4d8] sm:$0xf0] }
  0x9c   :  { %1554 = vmatpush.bf16.msra.mxu1 %v2742_v54  ;;  %v2314_v54 = vor.u32 %v3104_v44, %v2311_v45  ;;  %v2247_v44 = vld [vmem:[#allocation5 + $0x118] sm:$0xf0] }
  0x9d   :  { %1548 = vmatpush.bf16.msra.mxu2 %v2502_v0  ;;  %1523 = vmatmul.bf16.vlgmr.msrb.gmra.mxu3 %v3528_v9  ;;  %v2151_v0 = vld [vmem:[#allocation5 + $0x58] sm:$0xf0] }
  0x9e   :  { %1567 = vmatpush.bf16.msra.mxu3 %v2870_v59  ;;  %1536 = vmatmul.bf16.vlgmr.msra.gmra.mxu0 %v3520_v53  ;;  %v3100_v59 = vld [vmem:[#allocation5 + $0x16c] sm:$0xf]  ;;  %v2551_v22 = vld [vmem:[#allocation5 + $0x378] sm:$0xf0] }
  0x9f   :  { %1587 = vmatpush.bf16.msrb.mxu0 %v2886_v4  ;;  %v2298_v4 = vor.u32 %v3100_v59, %v2295_v61  ;;  %v3172_v59 = vld [vmem:[#allocation5 + $0x3ac] sm:$0xf]  ;;  %v2583_v61 = vld [vmem:[#allocation5 + $0x3b8] sm:$0xf0] }
  0xa0   :  { %1555 = vmatpush.bf16.msra.mxu1 %v2726_v7  ;;  %1549 = vmatmul.bf16.vlgmr.msra.gmra.mxu2 %v3524_v60  ;;  %v2154_v7 = vor.u32 %v3064_v63, %v2151_v0  ;;  %v3240_v63 = vld [vmem:[#allocation5 + $0x5cc] sm:$0xf]  ;;  %v2855_v0 = vld [vmem:[#allocation5 + $0x5d8] sm:$0xf0] }
  0xa1   :  { %1593 = vmatpush.bf16.msrb.mxu2 %v2234_v3  ;;  %v3190_v3 = vld [vmem:[#allocation5 + $0x434] sm:$0xf0]  ;;  %v2807_v38 = vld [vmem:[#allocation5 + $0x578] sm:$0xf0] }
  0xa2   :  { %1568 = vmatpush.bf16.msra.mxu3 %v2854_v11  ;;  %v2646_v11 = vor.u32 %v3190_v3, %v2645_v2  ;;  %v3204_v2 = vld [vmem:[#allocation5 + $0x4ac] sm:$0xf]  ;;  %v2711_v3 = vld [vmem:[#allocation5 + $0x4b8] sm:$0xf0] }
  0xa3   :  { %1606 = vmatpush.bf16.msra.mxu0 %v2362_v14  ;;  %v2629_v14 = vld [vmem:[#allocation5 + $0x408] sm:$0xf] }
  0xa4   :  { %1556 = vmatpush.bf16.msra.mxu1 %v2710_v20  ;;  %v3148_v20 = vld [vmem:[#allocation5 + $0x2ec] sm:$0xf]  ;;  %v2630_v27 = vor.u32 %v3186_v16, %v2629_v14  ;;  %v2442_v14 = vor.u32 %v3136_v5, %v2439_v6  ;;  %v2695_v16 = vld [vmem:[#allocation5 + $0x498] sm:$0xf0] }
  0xa5   :  { %1594 = vmatpush.bf16.msrb.mxu2 %v2218_v17  ;;  %v2757_v17 = vld [vmem:[#allocation5 + $0x508] sm:$0xf]  ;;  %v2490_v31 = vor.u32 %v3148_v20, %v2487_v21  ;;  %v3164_v21 = vld [vmem:[#allocation5 + $0x36c] sm:$0xf]  ;;  %v2887_v6 = vld [vmem:[#allocation5 + $0x618] sm:$0xf0] }
  0xa6   :  { %1569 = vmatpush.bf16.msra.mxu3 %v2838_v23  ;;  %v2138_v23 = vor.u32 %v3060_v12, %v2135_v13  ;;  %v2758_v30 = vor.u32 %v3218_v18, %v2757_v17  ;;  %v3236_v12 = vld [vmem:[#allocation5 + $0x5ac] sm:$0xf]  ;;  %v2839_v13 = vld [vmem:[#allocation5 + $0x5b8] sm:$0xf0]  ;;  %v2570_v17 = vor.u32 %v3168_v8, %v2567_v10 }
  0xa7   :  { %1607 = vmatpush.bf16.msra.mxu0 %v2346_v26  ;;  %v2263_v26 = vld [vmem:[#allocation5 + $0x138] sm:$0xf0]  ;;  %v3132_v18 = vld [vmem:[#allocation5 + $0x26c] sm:$0xf]  ;;  %v2842_v20 = vor.u32 %v3236_v12, %v2839_v13 }
  0xa8   :  { %1557 = vmatpush.bf16.msra.mxu1 %v2694_v32  ;;  %v3212_v32 = vld [vmem:[#allocation5 + $0x4ec] sm:$0xf] }
  0xa9   :  { %1595 = vmatpush.bf16.msrb.mxu2 %v2202_v29  ;;  %v2119_v29 = vld [vmem:[#allocation5 + $0x18] sm:$0xf0]  ;;  %v2746_v45 = vor.u32 %v3212_v32, %v2743_v33  ;;  %v3160_v33 = vld [vmem:[#allocation5 + $0x34c] sm:$0xf] }
  0xaa   :  { %1570 = vmatpush.bf16.msra.mxu3 %v2822_v36  ;;  %v2266_v36 = vor.u32 %v3092_v25, %v2263_v26  ;;  %v2122_v41 = vor.u32 %v3056_v28, %v2119_v29  ;;  %v2823_v25 = vld [vmem:[#allocation5 + $0x598] sm:$0xf0]  ;;  %v3128_v29 = vld [vmem:[#allocation5 + $0x24c] sm:$0xf] }
  0xab   :  { %1608 = vmatpush.bf16.msra.mxu0 %v2330_v40  ;;  %v3176_v40 = vld [vmem:[#allocation5 + $0x3cc] sm:$0xf]  ;;  %v2679_v28 = vld [vmem:[#allocation5 + $0x478] sm:$0xf0] }
  0xac   :  { %1558 = vmatpush.bf16.msra.mxu1 %v2678_v46  ;;  %v3244_v46 = vld [vmem:[#allocation5 + $0x5ec] sm:$0xf]  ;;  %v2602_v52 = vor.u32 %v3176_v40, %v2599_v42 }
  0xad   :  { %1596 = vmatpush.bf16.msrb.mxu2 %v2186_v43  ;;  %v3088_v43 = vld [vmem:[#allocation5 + $0x10c] sm:$0xf] }
  0xae   :  { %1571 = vmatpush.bf16.msra.mxu3 %v2806_v50  ;;  %2893 = vmatmul.msk.bf16.vlgmr.msrb.gmra.mxu0 %vm1316_vm0, %v3532_v48  ;;  %v3208_v50 = vld [vmem:[#allocation5 + $0x4cc] sm:$0xf] }
  0xaf   :  { %1609 = vmatpush.bf16.msra.mxu0 %v2314_v54  ;;  %v2250_v54 = vor.u32 %v3088_v43, %v2247_v44  ;;  %v3192_v42 = vld [vmem:[#allocation5 + $0x44c] sm:$0xf]  ;;  %v2663_v43 = vld [vmem:[#allocation5 + $0x458] sm:$0xf0] }
  0xb0   :  { %1559 = vmatpush.bf16.msra.mxu1 %v2662_v62  ;;  %v2730_v62 = vor.u32 %v3208_v50, %v2727_v51  ;;  %v3156_v50 = vld [vmem:[#allocation5 + $0x32c] sm:$0xf]  ;;  %v2519_v51 = vld [vmem:[#allocation5 + $0x338] sm:$0xf0] }
  0xb1   :  { %1597 = vmatpush.bf16.msrb.mxu2 %v2170_v58  ;;  %v2874_v58 = vor.u32 %v3244_v46, %v2871_v47  ;;  %v3124_v46 = vld [vmem:[#allocation5 + $0x22c] sm:$0xf]  ;;  %v2391_v47 = vld [vmem:[#allocation5 + $0x238] sm:$0xf0] }
  0xb2   :  { %1572 = vmatpush.bf16.msra.mxu3 %v2790_v1  ;;  %v2458_v1 = vor.u32 %v3140_v55, %v2455_v56  ;;  %v3224_v55 = vld [vmem:[#allocation5 + $0x54c] sm:$0xf]  ;;  %v2791_v56 = vld [vmem:[#allocation5 + $0x558] sm:$0xf0] }
  0xb3   :  { %1610 = vmatpush.bf16.msra.mxu0 %v2298_v4  ;;  %v2586_v4 = vor.u32 %v3172_v59, %v2583_v61  ;;  %v2394_v59 = vor.u32 %v3124_v46, %v2391_v47  ;;  %v3188_v61 = vld [vmem:[#allocation5 + $0x42c] sm:$0xf]  ;;  %v3261_v46 = vld [vmem:[#allocation8 + $0x50] sm:$0xff] }
  0xb4   :  { %1560 = vmatpush.bf16.msra.mxu1 %v2646_v11  ;;  %v2714_v11 = vor.u32 %v3204_v2, %v2711_v3  ;;  %v3152_v2 = vld [vmem:[#allocation5 + $0x30c] sm:$0xf]  ;;  %v2794_v3 = vor.u32 %v3224_v55, %v2791_v56  ;;  %v3259_v55 = vld [vmem:[#allocation8 + $0x40] sm:$0xff] }
  0xb5   :  { %1598 = vmatpush.bf16.msrb.mxu2 %v2154_v7  ;;  %v2858_v7 = vor.u32 %v3240_v63, %v2855_v0  ;;  %v2522_v63 = vor.u32 %v3156_v50, %v2519_v51  ;;  %v3120_v0 = vld [vmem:[#allocation5 + $0x20c] sm:$0xf]  ;;  %v3251_v51 = vld [vmem:[#allocation8] sm:$0xff] }
  0xb6   :  { %1573 = vmatpush.bf16.msra.mxu3 %v2774_v15  ;;  %v3200_v15 = vld [vmem:[#allocation5 + $0x48c] sm:$0xf] }
  0xb7   :  { %1611 = vmatpush.bf16.msra.mxu0 %v2282_v19  ;;  %v2423_v19 = vld [vmem:[#allocation5 + $0x278] sm:$0xf0]  ;;  %v3562_v32 = vpop.f32.mrf.mxu1  ;;  %v3248_v5 = vld [vmem:[#allocation5 + $0x60c] sm:$0xf] }
  0xb8   :  { %1561 = vmatpush.bf16.msra.mxu1 %v2630_v27  ;;  %v2426_v26 = vor.u32 %v3132_v18, %v2423_v19  ;;  %v3196_v27 = vld [vmem:[#allocation5 + $0x46c] sm:$0xf]  ;;  %v2890_v18 = vor.u32 %v3248_v5, %v2887_v6  ;;  %v3274_v5 = vld [vmem:[#allocation8 + $0xb8] sm:$0xff] }
  0xb9   :  { %1599 = vmatpush.bf16.msrb.mxu2 %v2138_v23  ;;  %v3560_v23 = vpop.f32.mrf.mxu0  ;;  %v3220_v10 = vld [vmem:[#allocation5 + $0x52c] sm:$0xf] }
  0xba   :  { %1574 = vmatpush.bf16.msra.mxu3 %v2758_v30  ;;  %v2407_v30 = vld [vmem:[#allocation5 + $0x258] sm:$0xf0]  ;;  %v3260_v50 = vld [vmem:[#allocation8 + $0x48] sm:$0xff] }
  0xbb   :  { %1612 = vmatpush.bf16.msra.mxu0 %v2266_v36  ;;  %1562 = vmatmul.bf16.vlgmr.msra.gmra.mxu1 %v3536_v34  ;;  %v2682_v36 = vor.u32 %v3196_v27, %v2679_v28  ;;  %v3257_v27 = vld [vmem:[#allocation8 + $0x30] sm:$0xff] }
  0xbc   :  { %1619 = vmatpush.bf16.msrb.mxu1 %v2490_v31  ;;  %v2826_v31 = vor.u32 %v3232_v24, %v2823_v25  ;;  %v2759_v24 = vld [vmem:[#allocation5 + $0x518] sm:$0xf0] }
  0xbd   :  { %1600 = vmatpush.bf16.msrb.mxu2 %v2122_v41  ;;  %1575 = vmatmul.bf16.vlgmr.msra.gmra.mxu3 %v3538_v39  ;;  %v2410_v41 = vor.u32 %v3128_v29, %v2407_v30  ;;  %v3266_v25 = vld [vmem:[#allocation8 + $0x78] sm:$0xff]  ;;  %v3265_v29 = vld [vmem:[#allocation8 + $0x70] sm:$0xff] }
  0xbe   :  { %1632 = vmatpush.bf16.msrb.mxu3 %v2618_v35  ;;  %v2535_v35 = vld [vmem:[#allocation5 + $0x358] sm:$0xf0]  ;;  %v3564_v40 = vpop.f32.mrf.mxu2 }
  0xbf   :  { %1613 = vmatpush.bf16.msra.mxu0 %v2250_v54  ;;  %v2538_v44 = vor.u32 %v3160_v33, %v2535_v35  ;;  %v2666_v54 = vor.u32 %v3192_v42, %v2663_v43  ;;  %v3253_v42 = vld [vmem:[#allocation8 + $0x10] sm:$0xff] }
  0xc0   :  { %1620 = vmatpush.bf16.msrb.mxu1 %v2474_v49  ;;  %1601 = vmatmul.bf16.vlgmr.msrb.gmra.mxu2 %v3522_v57  ;;  %v2698_v57 = vor.u32 %v3200_v15, %v2695_v16  ;;  %v2810_v49 = vor.u32 %v3228_v37, %v2807_v38  ;;  %v2631_v15 = vld [vmem:[#allocation5 + $0x418] sm:$0xf0]  ;;  %v3263_v37 = vld [vmem:[#allocation8 + $0x60] sm:$0xff] }
  0xc1   :  { %1645 = vmatpush.bf16.msra.mxu2 %v2746_v45  ;;  %v3566_v45 = vpop.f32.mrf.mxu3  ;;  %v3254_v38 = vld [vmem:[#allocation8 + $0x18] sm:$0xff] }
  0xc2   :  { %1633 = vmatpush.bf16.msrb.mxu3 %v2602_v52  ;;  %1614 = vmatmul.bf16.vlgmr.msra.gmra.mxu0 %v3528_v9  ;;  %v2554_v9 = vor.u32 %v3164_v21, %v2551_v22  ;;  %v1331_v52 = vpop.f32.mrf.mxu0 }
  0xc3   :  { %1658 = vmatpush.bf16.msrb.mxu0 %v2874_v58  ;;  %v3568_v58 = vld [vmem:[#allocation7] sm:$0xf] }
  0xc4   :  { %1621 = vmatpush.bf16.msrb.mxu1 %v2458_v1  ;;  %v2375_v1 = vld [vmem:[#allocation5 + $0x218] sm:$0xf0]  ;;  %v304_v16 = vperm.slane %v3568_v58, 0 }
  0xc5   :  { %1646 = vmatpush.bf16.msra.mxu2 %v2730_v62  ;;  %v2647_v62 = vld [vmem:[#allocation5 + $0x438] sm:$0xf0]  ;;  %v2378_v13 = vor.u32 %v3120_v0, %v2375_v1 }
  0xc6   :  { %1634 = vmatpush.bf16.msrb.mxu3 %v2586_v4  ;;  %v2503_v4 = vld [vmem:[#allocation5 + $0x318] sm:$0xf0]  ;;  %v2650_v8 = vor.u32 %v3188_v61, %v2647_v62  ;;  %v1357_v12 = vpop.f32.mrf.mxu2 }
  0xc7   :  { %1659 = vmatpush.bf16.msrb.mxu0 %v2858_v7  ;;  %v1344_v7 = vpop.f32.mrf.mxu1  ;;  %v3272_v12 = vld [vmem:[#allocation8 + $0xa8] sm:$0xff] }
  0xc8   :  { %1622 = vmatpush.bf16.msrb.mxu1 %v2442_v14  ;;  %v3184_v14 = vld [vmem:[#allocation5 + $0x40c] sm:$0xf] }
  0xc9   :  { %1647 = vmatpush.bf16.msra.mxu2 %v2714_v11  ;;  %v2775_v11 = vld [vmem:[#allocation5 + $0x538] sm:$0xf0]  ;;  %v1370_v19 = vpop.f32.mrf.mxu3  ;;  %v2634_v22 = vor.u32 %v3184_v14, %v2631_v15 }
  0xca   :  { %1635 = vmatpush.bf16.msrb.mxu3 %v2570_v17  ;;  %v2506_v17 = vor.u32 %v3152_v2, %v2503_v4  ;;  %v2778_v21 = vor.u32 %v3220_v10, %v2775_v11 }
  0xcb   :  { %1660 = vmatpush.bf16.msrb.mxu0 %v2842_v20  ;;  %v3258_v20 = vld [vmem:[#allocation8 + $0x38] sm:$0xff] }
  0xcc   :  { %1623 = vmatpush.bf16.msrb.mxu1 %v2426_v26  ;;  %v1330_v26 = vadd.f32 %v3560_v23, %v304_v16  ;;  %v3256_v23 = vld [vmem:[#allocation8 + $0x28] sm:$0xff] }
  0xcd   :  { %1648 = vmatpush.bf16.msra.mxu2 %v2698_v57  ;;  %v3216_v57 = vld [vmem:[#allocation5 + $0x50c] sm:$0xf] }
  0xce   :  { %1636 = vmatpush.bf16.msrb.mxu3 %v2554_v9  ;;  %v2762_v28 = vor.u32 %v3216_v57, %v2759_v24  ;;  %v1407_v9 = vpop.f32.mrf.mxu2  ;;  %v1343_v30 = vadd.f32 %v3562_v32, %v1330_v26 }
  0xcf   :  { %1661 = vmatpush.bf16.msrb.mxu0 %v2826_v31  ;;  %v3264_v31 = vld [vmem:[#allocation8 + $0x68] sm:$0xff] }
  0xd0   :  { %1624 = vmatpush.bf16.msrb.mxu1 %v2410_v41  ;;  %v1356_v33 = vadd.f32 %v3564_v40, %v1343_v30  ;;  %v3262_v41 = vld [vmem:[#allocation8 + $0x58] sm:$0xff] }
  0xd1   :  { %1649 = vmatpush.bf16.msra.mxu2 %v2682_v36  ;;  %v3282_v30 = vld [vmem:[#allocation8 + $0xf8] sm:$0xff] }
  0xd2   :  { %1637 = vmatpush.bf16.msrb.mxu3 %v2538_v44  ;;  %v1369_v32 = vadd.f32 %v3566_v45, %v1356_v33  ;;  %v306_v33 = vperm.slane %v3568_v58, 2 }
  0xd3   :  { %1662 = vmatpush.bf16.msrb.mxu0 %v2810_v49  ;;  %v3252_v49 = vld [vmem:[#allocation8 + $0x8] sm:$0xff] }
  0xd4   :  { %1625 = vmatpush.bf16.msrb.mxu1 %v2394_v59 }
  0xd5   :  { %1650 = vmatpush.bf16.msra.mxu2 %v2666_v54 }
  0xd6   :  { %1638 = vmatpush.bf16.msrb.mxu3 %v2522_v63  ;;  %v1409_v36 = vpop.f32.mrf.mxu2 }
  0xd7   :  { %1663 = vmatpush.bf16.msrb.mxu0 %v2794_v3  ;;  %v1381_v35 = vpop.f32.mrf.mxu0 }
  0xd8   :  { %1626 = vmatpush.bf16.msrb.mxu1 %v2378_v13 }
  0xd9   :  { %1651 = vmatpush.bf16.msra.mxu2 %v2650_v8  ;;  %v3273_v8 = vld [vmem:[#allocation8 + $0xb0] sm:$0xff] }
  0xda   :  { %1639 = vmatpush.bf16.msrb.mxu3 %v2506_v17  ;;  %v3271_v17 = vld [vmem:[#allocation8 + $0xa0] sm:$0xff] }
  0xdb   :  { %1664 = vmatpush.bf16.msrb.mxu0 %v2778_v21  ;;  %1627 = vmatmul.bf16.vlgmr.msrb.gmra.mxu1 %v3520_v53  ;;  %v3255_v53 = vld [vmem:[#allocation8 + $0x20] sm:$0xff]  ;;  %v3270_v21 = vld [vmem:[#allocation8 + $0x98] sm:$0xff] }
  0xdc   :  { %1678 = vmatpush.bf16.msra.mxu1 %v2890_v18 }
  0xdd   :  { %1652 = vmatpush.bf16.msra.mxu2 %v2634_v22  ;;  %1640 = vmatmul.bf16.vlgmr.msrb.gmra.mxu3 %v3524_v60  ;;  %v1394_v60 = vpop.f32.mrf.mxu1  ;;  %v3269_v22 = vld [vmem:[#allocation8 + $0x90] sm:$0xff] }
  0xde   :  { %1952 = vmatpush.bf16.msra.mxu3 %v3258_v20 }
  0xdf   :  { %1665 = vmatpush.bf16.msrb.mxu0 %v2762_v28 }
  0xe0   :  { %1965 = vmatpush.bf16.msrb.mxu1 %v3266_v25  ;;  %1653 = vmatmul.bf16.vlgmr.msra.gmra.mxu2 %v3536_v34  ;;  %v1382_v34 = vadd.f32 %v1381_v35, %v1369_v32  ;;  %v1420_v40 = vpop.f32.mrf.mxu3  ;;  %v3268_v25 = vld [vmem:[#allocation8 + $0x88] sm:$0xff] }
  0xe1   :  { %1978 = vmatpush.bf16.msrb.mxu2 %v3274_v5 }
  0xe2   :  { %1953 = vmatpush.bf16.msra.mxu3 %v3257_v27  ;;  %1666 = vmatmul.bf16.vlgmr.msrb.gmra.mxu0 %v3538_v39  ;;  %v1395_v43 = vadd.f32 %v1394_v60, %v1382_v34  ;;  %v1383_v39 = vpop.f32.mrf.mxu0  ;;  %v3267_v27 = vld [vmem:[#allocation8 + $0x80] sm:$0xff] }
  0xe3   :  { %v1433_v47 = vpop.f32.mrf.mxu2  ;;  %1991 = vmatpush.bf16.msra.mxu0 %v3282_v30 }
  0xe4   :  { %1966 = vmatpush.bf16.msrb.mxu1 %v3265_v29  ;;  %v1408_v45 = vadd.f32 %v1407_v9, %v1395_v43  ;;  %v3278_v43 = vld [vmem:[#allocation8 + $0xd8] sm:$0xff] }
  0xe5   :  { %v1396_v44 = vpop.f32.mrf.mxu1  ;;  %1979 = vmatpush.bf16.msrb.mxu2 %v3273_v8 }
  0xe6   :  { %1954 = vmatpush.bf16.msra.mxu3 %v3256_v23  ;;  %v1684_v52 = vmax.f32 %v1408_v45, 0.0  ;;  %v3281_v23 = vld [vmem:[#allocation8 + $0xf0] sm:$0xff] }
  0xe7   :  { %1992 = vmatpush.bf16.msra.mxu0 %v3281_v23  ;;  %v3283_v23 = vld [vmem:[#allocation10] sm:$0xff] }
  0xe8   :  { %1967 = vmatpush.bf16.msrb.mxu1 %v3264_v31  ;;  %v1422_v54 = vpop.f32.mrf.mxu3  ;;  %v1688_v59 = vpack.c.bf16 %v1684_v52, %v1684_v52  ;;  %v3276_v52 = vld [vmem:[#allocation8 + $0xc8] sm:$0xff] }
  0xe9   :  { %1980 = vmatpush.bf16.msrb.mxu2 %v3272_v12 }
  0xea   :  { %1955 = vmatpush.bf16.msra.mxu3 %v3255_v53 }
  0xeb   :  { %2894 = vmatmul.msk.bf16.vlgmr.msra.gmra.mxu1 %vm1316_vm0, %v3532_v48  ;;  %v1435_v56 = vpop.f32.mrf.mxu2  ;;  %v305_v48 = vperm.slane %v3568_v58, 1 }
  0xec   :  { %1968 = vmatpush.bf16.msrb.mxu1 %v3263_v37  ;;  %v3280_v37 = vld [vmem:[#allocation8 + $0xe8] sm:$0xff] }
  0xed   :  { %v1421_v61 = vadd.f32 %v1420_v40, %v305_v48  ;;  %1981 = vmatpush.bf16.msrb.mxu2 %v3271_v17  ;;  %1993 = vmatpush.bf16.msra.mxu0 %v3280_v37  ;;  %v3275_v48 = vld [vmem:[#allocation8 + $0xc0] sm:$0xff] }
  0xee   :  { %1956 = vmatpush.bf16.msra.mxu3 %v3254_v38  ;;  %v3279_v38 = vld [vmem:[#allocation8 + $0xe0] sm:$0xff] }
  0xef   :  { %v1434_v62 = vadd.f32 %v1433_v47, %v1421_v61  ;;  %v307_v61 = vperm.slane %v3568_v58, 3 }
  0xf0   :  { %1969 = vmatpush.bf16.msrb.mxu1 %v3262_v41 }
  0xf1   :  { %1982 = vmatpush.bf16.msrb.mxu2 %v3270_v21  ;;  %1994 = vmatpush.bf16.msra.mxu0 %v3279_v38 }
  0xf2   :  { %1957 = vmatpush.bf16.msra.mxu3 %v3253_v42 }
  0xf4   :  { %1970 = vmatpush.bf16.msrb.mxu1 %v3261_v46  ;;  %v3277_v46 = vld [vmem:[#allocation8 + $0xd0] sm:$0xff] }
  0xf5   :  { %1983 = vmatpush.bf16.msrb.mxu2 %v3269_v22  ;;  %1995 = vmatpush.bf16.msra.mxu0 %v3278_v43 }
  0xf6   :  { %1958 = vmatpush.bf16.msra.mxu3 %v3252_v49 }
  0xf7   :  { %v1446_v63 = vpop.f32.mrf.mxu0 }
  0xf8   :  { %1971 = vmatpush.bf16.msrb.mxu1 %v3260_v50  ;;  %v1447_v0 = vadd.f32 %v1446_v63, %v1434_v62  ;;  %v1459_v1 = vpop.f32.mrf.mxu1 }
  0xf9   :  { %1984 = vmatpush.bf16.msrb.mxu2 %v3268_v25  ;;  %1996 = vmatpush.bf16.msra.mxu0 %v3277_v46  ;;  %v3289_v25 = vld [vmem:[#allocation10 + $0x30] sm:$0xff] }
  0xfa   :  { %1959 = vmatpush.bf16.msra.mxu3 %v3251_v51  ;;  %v1460_v2 = vadd.f32 %v1459_v1, %v1447_v0 }
  0xfc   :  { %1972 = vmatpush.bf16.msrb.mxu1 %v3259_v55 }
  0xfd   :  { %1960 = vmatmul.bf16.vlgmr.msra.gmra.mxu3 %v1688_v59  ;;  %1985 = vmatpush.bf16.msrb.mxu2 %v3267_v27  ;;  %v3287_v27 = vld [vmem:[#allocation10 + $0x20] sm:$0xff] }
  0xfe   :  { %1997 = vmatpush.bf16.msra.mxu0 %v3276_v52 }
  0xff   :  { %v1448_v3 = vpop.f32.mrf.mxu0 }
 0x100   :  { %v1472_v4 = vpop.f32.mrf.mxu3  ;;  %v1461_v10 = vpop.f32.mrf.mxu1 }
 0x101   :  { %v1473_v6 = vadd.f32 %v1472_v4, %v1460_v2 }
 0x102   :  { %1998 = vmatpush.bf16.msra.mxu0 %v3275_v48 }
 0x103   :  { %v1485_v7 = vpop.f32.mrf.mxu2 }
 0x104   :  { %v1486_v11 = vadd.f32 %v1485_v7, %v1473_v6 }
 0x107   :  { %v1498_v13 = vpop.f32.mrf.mxu0 }
 0x108   :  { %v1474_v14 = vpop.f32.mrf.mxu3  ;;  %v1499_v15 = vadd.f32 %v1498_v13, %v1486_v11 }
 0x10a   :  { %v1685_v18 = vmax.f32 %v1499_v15, 0.0 }
 0x10b   :  { %v1487_v16 = vpop.f32.mrf.mxu2 }
 0x10c   :  { %v1689_v19 = vpack.c.bf16 %v1685_v18, %v1685_v18 }
 0x10e   :  { %1973 = vmatmul.bf16.vlgmr.msrb.gmra.mxu1 %v1689_v19  ;;  %v3301_v19 = vld [vmem:[%s3597_s4] ss:$0 sm:$0xff] }
 0x10f   :  { %v1500_v20 = vpop.f32.mrf.mxu0 }
 0x118   :  { %v1511_v24 = vpop.f32.mrf.mxu1 }
 0x119   :  { %v1512_v60 = vadd.f32 %v1511_v24, %v306_v33  ;;  %v3290_v24 = vld [vmem:[#allocation10 + $0x38] sm:$0xff] }
 0x11a   :  { %2074 = vmatpush.bf16.msrb.mxu3 %v3290_v24 }
 0x11b   :  { %v1537_v57 = vpop.f32.mrf.mxu0 }
 0x11e   :  { %2075 = vmatpush.bf16.msrb.mxu3 %v3289_v25 }
 0x120   :  { %v1524_v26 = vpop.f32.mrf.mxu3  ;;  %v1513_v29 = vpop.f32.mrf.mxu1 }
 0x121   :  { %v1525_v36 = vadd.f32 %v1524_v26, %v1512_v60  ;;  %v3288_v26 = vld [vmem:[#allocation10 + $0x28] sm:$0xff] }
 0x122   :  { %2076 = vmatpush.bf16.msrb.mxu3 %v3288_v26  ;;  %v3284_v29 = vld [vmem:[#allocation10 + $0x8] sm:$0xff] }
 0x123   :  { %v1539_v28 = vpop.f32.mrf.mxu0  ;;  %v1550_v9 = vpop.f32.mrf.mxu2  ;;  %v1538_v34 = vadd.f32 %v1537_v57, %v1525_v36 }
 0x124   :  { %v3286_v28 = vld [vmem:[#allocation10 + $0x18] sm:$0xff] }
 0x125   :  { %v1551_v42 = vadd.f32 %v1550_v9, %v1538_v34  ;;  %v3285_v9 = vld [vmem:[#allocation10 + $0x10] sm:$0xff] }
 0x126   :  { %2077 = vmatpush.bf16.msrb.mxu3 %v3287_v27 }
 0x128   :  { %v1526_v31 = vpop.f32.mrf.mxu3 }
 0x12a   :  { %2078 = vmatpush.bf16.msrb.mxu3 %v3286_v28 }
 0x12b   :  { %v1589_v53 = vpop.f32.mrf.mxu0  ;;  %v1552_v35 = vpop.f32.mrf.mxu2 }
 0x12e   :  { %2079 = vmatpush.bf16.msrb.mxu3 %v3285_v9 }
 0x132   :  { %2080 = vmatpush.bf16.msrb.mxu3 %v3284_v29 }
 0x133   :  { %v1591_v32 = vpop.f32.mrf.mxu0 }
 0x134   :  { %v3302_v32 = vld [vmem:[%s3599_s6] ss:$0 sm:$0xff] }
 0x136   :  { %2081 = vmatpush.bf16.msrb.mxu3 %v3283_v23 }
 0x138   :  { %v1563_v41 = vpop.f32.mrf.mxu1 }
 0x139   :  { %v1564_v39 = vadd.f32 %v1563_v41, %v1551_v42 }
 0x13f   :  { %v1615_v40 = vpop.f32.mrf.mxu0 }
 0x140   :  { %v1576_v44 = vpop.f32.mrf.mxu3  ;;  %v1565_v49 = vpop.f32.mrf.mxu1 }
 0x141   :  { %v1577_v47 = vadd.f32 %v1576_v44, %v1564_v39 }
 0x143   :  { %v1590_v45 = vadd.f32 %v1589_v53, %v1577_v47  ;;  %v1602_v50 = vpop.f32.mrf.mxu2 }
 0x144   :  { %v1603_v62 = vadd.f32 %v1602_v50, %v307_v61 }
 0x145   :  { %v1686_v51 = vmax.f32 %v1590_v45, 0.0 }
 0x146   :  { %v1616_v0 = vadd.f32 %v1615_v40, %v1603_v62 }
 0x147   :  { %v1690_v54 = vpack.c.bf16 %v1686_v51, %v1686_v51  ;;  %v1617_v55 = vpop.f32.mrf.mxu0 }
 0x148   :  { %v1578_v56 = vpop.f32.mrf.mxu3 }
 0x149   :  { %1986 = vmatmul.bf16.vlgmr.msrb.gmra.mxu2 %v1690_v54 }
 0x14b   :  { %v1604_v59 = vpop.f32.mrf.mxu2 }
 0x158   :  { %v1628_v63 = vpop.f32.mrf.mxu1 }
 0x159   :  { %v1629_v1 = vadd.f32 %v1628_v63, %v1616_v0 }
 0x15f   :  { %v1667_v3 = vpop.f32.mrf.mxu0 }
 0x160   :  { %v1641_v2 = vpop.f32.mrf.mxu3  ;;  %v1630_v5 = vpop.f32.mrf.mxu1 }
 0x161   :  { %v1642_v4 = vadd.f32 %v1641_v2, %v1629_v1 }
 0x163   :  { %v1654_v6 = vpop.f32.mrf.mxu2 }
 0x164   :  { %v1655_v7 = vadd.f32 %v1654_v6, %v1642_v4 }
 0x166   :  { %v1668_v11 = vadd.f32 %v1667_v3, %v1655_v7 }
 0x167   :  { %v1669_v10 = vpop.f32.mrf.mxu0 }
 0x168   :  { %v1643_v8 = vpop.f32.mrf.mxu3  ;;  %v1680_v12 = vpop.f32.mrf.mxu1 }
 0x169   :  { %v1681_v13 = vadd.f32 %v1680_v12, %v1668_v11 }
 0x16b   :  { %v1656_v14 = vpop.f32.mrf.mxu2  ;;  %v1687_v15 = vmax.f32 %v1681_v13, 0.0 }
 0x16d   :  { %v1691_v16 = vpack.c.bf16 %v1687_v15, %v1687_v15 }
 0x16f   :  { %1999 = vmatmul.bf16.vlgmr.msra.gmra.mxu0 %v1691_v16 }
 0x170   :  { %v1682_v58 = vpop.f32.mrf.mxu1 }
 0x180   :  { %v1961_v17 = vpop.f32.mrf.mxu3 }
 0x181   :  { %v1962_v20 = vadd.f32 %v3301_v19, %v1961_v17 }
 0x188   :  { %v1963_v18 = vpop.f32.mrf.mxu3 }
 0x18b   :  { %v1974_v21 = vpop.f32.mrf.mxu1 }
 0x18c   :  { %v1975_v22 = vadd.f32 %v1974_v21, %v1962_v20 }
 0x193   :  { %v1976_v57 = vpop.f32.mrf.mxu1 }
 0x1cc   :  { %v1987_v30 = vpop.f32.mrf.mxu2 }
 0x1cd   :  { %v1988_v33 = vadd.f32 %v1987_v30, %v1975_v22 }
 0x1d4   :  { %v1989_v31 = vpop.f32.mrf.mxu2 }
 0x1ec   :  { %v2000_v53 = vpop.f32.mrf.mxu0 }
 0x1ed   :  { %v2001_v35 = vadd.f32 %v2000_v53, %v1988_v33 }
 0x1ef   :  { %v2004_v60 = vmax.f32 %v2001_v35, 0.0 }
 0x1f1   :  { %v2005_v36 = vpack.c.bf16 %v2004_v60, %v2004_v60 }
 0x1f3   :  { %2082 = vmatmul.bf16.vlgmr.msrb.gmra.mxu3 %v2005_v36 }
 0x1f4   :  { %v2002_v37 = vpop.f32.mrf.mxu0 }
 0x276   :  { %v2083_v38 = vpop.f32.mrf.mxu3 }
 0x277   :  { %v2084_v34 = vadd.f32 %v3302_v32, %v2083_v38 }
 0x279   :  { %2087 = vst [vmem:[#allocation11] sm:$0xff] %v2084_v34 }
 0x27a   :  { %2098 = dma.vmem_to_hbm [thread:$0]  %s2094_s29, 128, %s2096_s9, [#allocation4]  }
 0x27e   :  { %v2085_v41 = vpop.f32.mrf.mxu3 }
 0x27f   :  { %3453 = dma.done.wait [#allocation4], 128  }
 0x280   :  { %3454 = vsyncadd [#allocation4], 4294967168 }
 0x281   :  { %2103 = vsyncpa [#allocation3], 1 }
 0x282   :  { %2104 = vsyncpa [#allocation6], 1 }
 0x283   :  { %2105 = vsyncpa [#allocation9], 1 }
 0x284   :  { %2106 = vsyncpa [#allocation4], 1 }

</bundles_post_ra>
